<compile_context>
chip_gen: v7x
topology: tpu7x:2x2x1
jax: 0.10.0
libtpu: 0.0.40
codegen_flags: <defaults>
</compile_context>

<pallas_src>
import functools

import jax
import jax.numpy as jnp
from jax.experimental import pallas as pl
from jax.experimental.pallas import tpu as pltpu


def _lstm_reg_kernel(
    x_ref,       # (S*B, I)  f32, seq-major: rows t*B .. t*B+B-1 are timestep t
    wih0_ref,    # (I, 4H)   bf16, pre-transposed
    whh0_ref,    # (H, 4H)   bf16
    b0_ref,      # (1, 4H)   f32, b_ih_l0 + b_hh_l0
    wih1_ref,    # (H, 4H)   bf16
    whh1_ref,    # (H, 4H)   bf16
    b1_ref,      # (1, 4H)   f32, b_ih_l1 + b_hh_l1
    wreg_ref,    # (H, O)    f32, pre-transposed
    breg_ref,    # (1, O)    f32
    out_ref,     # (S*B, O)  f32
    pre0_ref,    # VMEM scratch (S*B, 4H) f32: batched layer-0 input projection
    *,
    seq_len,
    batch,
):
    S, B = seq_len, batch
    H = whh0_ref.shape[0]
    f32 = jnp.float32
    bf16 = jnp.bfloat16

    # ---- pre-loop: batched layer-0 input projection for ALL timesteps ----------
    # One bf16 matmul (f32 accumulate), b0 folded in, stored once to VMEM scratch.
    # Per-step reads below are plain vlds at static offsets that the scheduler can
    # hoist off the serial dependency chain.
    pre0_ref[...] = (
        jnp.dot(x_ref[...].astype(bf16), wih0_ref[...], preferred_element_type=f32)
        + b0_ref[...]
    )

    # Hoist loop-invariant weight loads and the b1 broadcast out of the loop
    # (broadcast_in_dim is not CSE'd).
    whh0 = whh0_ref[...]                               # bf16
    wih1 = wih1_ref[...]                               # bf16
    whh1 = whh1_ref[...]                               # bf16
    b1 = jnp.broadcast_to(b1_ref[...], (B, 4 * H))     # f32

    def gates_to_hc(gates, c_prev):
        # Full-width nonlinearities: 2 EUP passes over (B, 4H) instead of 4 passes
        # over sub-128-lane slices; gate layout follows PyTorch [i, f, g, o].
        # TODO(synk): if the bundle dump shows lane rotates between the EUP results
        # and the c/h VPU ops on the chain, permute the 4H gate columns offline so
        # i/f/g/o co-align with c_prev, or do the update at 4H width under a mask.
        sig = jax.nn.sigmoid(gates)
        th = jnp.tanh(gates)
        i_g = sig[:, 0 * H:1 * H]
        f_g = sig[:, 1 * H:2 * H]
        g_g = th[:, 2 * H:3 * H]
        o_g = sig[:, 3 * H:4 * H]
        c_new = f_g * c_prev + i_g * g_g
        h_new = o_g * jnp.tanh(c_new)
        return h_new, c_new

    # h/c state lives in vregs (loop-carried Python values, fully unrolled loop);
    # zero init matches PyTorch default when (h0, c0) are not provided.
    # c (and the h used for the output head) stay f32; only matmul operands are
    # bf16, cast once per step right after each h is produced.
    h0_bf = jnp.zeros((B, H), bf16)
    c0 = jnp.zeros((B, H), f32)
    h1_bf = jnp.zeros((B, H), bf16)
    c1 = jnp.zeros((B, H), f32)
    h1_hist = []   # vreg-resident h1 history (no VMEM scratch / masked stores)

    # S is static -> fully unrolled so the scheduler can overlap EUP / MXU / VPU
    # work across layers and adjacent timesteps.
    # TODO(synk): if S grows beyond ~16-32, switch to lax.fori_loop(unroll=4..8)
    # reading pre0_ref via pl.ds and writing the history via a ref, to bound vreg
    # pressure / code size.
    for t in range(S):
        # layer 0: only the recurrent bf16 matmul remains on the serial chain.
        g0 = pre0_ref[t * B:(t + 1) * B, :] + jnp.dot(
            h0_bf, whh0, preferred_element_type=f32)
        h0, c0 = gates_to_hc(g0, c0)
        h0_bf = h0.astype(bf16)

        # layer 1: the h1_prev @ Whh1 term is independent of this step's layer 0,
        # so it overlaps with the layer-0 compute on the unrolled schedule.
        g1 = (
            jnp.dot(h1_bf, whh1, preferred_element_type=f32)
            + jnp.dot(h0_bf, wih1, preferred_element_type=f32)
            + b1
        )
        h1, c1 = gates_to_hc(g1, c1)
        h1_bf = h1.astype(bf16)
        h1_hist.append(h1)          # f32, stays in vregs

    # ---- post-loop: regression head as ONE (S*B, H) @ (H, O) f32 matmul --------
    # Assembly of the history (sublane concat) happens once, off the recurrence
    # critical path, followed by a single bulk store of the output.
    hs = jnp.concatenate(h1_hist, axis=0)              # (S*B, H) f32
    y = jnp.dot(hs, wreg_ref[...], preferred_element_type=f32) + breg_ref[...]
    out_ref[...] = y.astype(out_ref.dtype)


@jax.jit
def lstm_reg_forward(x, params):
    """x: (seq, batch, input_size) float32 -> (seq, batch, output_size) float32."""
    S, B, I = x.shape
    H = params["w_hh_l0"].shape[1]          # (4H, H)
    O = params["w_reg"].shape[0]            # (O, H)
    bf16 = jnp.bfloat16

    # Glue: combine biases, pre-transpose weights (so the kernel does plain
    # (rows, K) @ (K, N) matmuls), and cast LSTM matmul weights to bf16 for
    # single-pass MXU dots; biases, head weights and all state stay f32.
    wih0 = params["w_ih_l0"].T.astype(bf16)              # (I, 4H)
    whh0 = params["w_hh_l0"].T.astype(bf16)              # (H, 4H)
    b0 = (params["b_ih_l0"] + params["b_hh_l0"]).reshape(1, 4 * H)
    wih1 = params["w_ih_l1"].T.astype(bf16)              # (H, 4H)
    whh1 = params["w_hh_l1"].T.astype(bf16)              # (H, 4H)
    b1 = (params["b_ih_l1"] + params["b_hh_l1"]).reshape(1, 4 * H)
    wreg = params["w_reg"].T                              # (H, O) f32
    breg = params["b_reg"].reshape(1, O)

    # Seq-major flatten (matches PyTorch's x.view(s*b, h) semantics downstream).
    x2 = x.reshape(S * B, I)

    vmem = pl.BlockSpec(memory_space=pltpu.MemorySpace.VMEM)
    kernel = functools.partial(_lstm_reg_kernel, seq_len=S, batch=B)

    # TODO(synk): for production-sized batch on v7x (2 TCs/chip), add a batch grid
    # axis with dimension_semantics=("parallel",) and replicated weight BlockSpecs;
    # for long S / big B, chunk the sequence (pre0 + history writeback) — v7x has
    # 64 MiB VMEM (half of v5e/v6e).  If this kernel is called repeatedly, carry
    # h/c via input_output_aliases and keep weights resident across calls: at this
    # size wall clock is dominated by launch + weight DMA, not the recurrence.
    out = pl.pallas_call(
        kernel,
        out_shape=jax.ShapeDtypeStruct((S * B, O), jnp.float32),
        in_specs=[vmem] * 9,
        out_specs=vmem,
        scratch_shapes=[pltpu.VMEM((S * B, 4 * H), jnp.float32)],  # layer-0 input proj
    )(x2, wih0, whh0, b0, wih1, whh1, b1, wreg, breg)
    return out.reshape(S, B, O)


def init_params(key, input_size, hidden_size, output_size):
    """PyTorch-style uniform(-1/sqrt(H), 1/sqrt(H)) init, deterministic."""
    H = hidden_size
    k = 1.0 / jnp.sqrt(jnp.asarray(H, jnp.float32))
    keys = jax.random.split(key, 10)

    def u(k_, shape):
        return jax.random.uniform(k_, shape, jnp.float32, -k, k)

    return {
        "w_ih_l0": u(keys[0], (4 * H, input_size)),
        "w_hh_l0": u(keys[1], (4 * H, H)),
        "b_ih_l0": u(keys[2], (4 * H,)),
        "b_hh_l0": u(keys[3], (4 * H,)),
        "w_ih_l1": u(keys[4], (4 * H, H)),
        "w_hh_l1": u(keys[5], (4 * H, H)),
        "b_ih_l1": u(keys[6], (4 * H,)),
        "b_hh_l1": u(keys[7], (4 * H,)),
        "w_reg": u(keys[8], (output_size, H)),
        "b_reg": u(keys[9], (output_size,)),
    }


def _reference_forward(x, params):
    """Pure-JAX f32 reference of the same PyTorch semantics (correctness check)."""
    S, B, I = x.shape
    H = params["w_hh_l0"].shape[1]

    def cell(x_t, h, c, wih, whh, bih, bhh):
        g = x_t @ wih.T + bih + h @ whh.T + bhh
        i = jax.nn.sigmoid(g[:, 0 * H:1 * H])
        f = jax.nn.sigmoid(g[:, 1 * H:2 * H])
        gg = jnp.tanh(g[:, 2 * H:3 * H])
        o = jax.nn.sigmoid(g[:, 3 * H:4 * H])
        c = f * c + i * gg
        h = o * jnp.tanh(c)
        return h, c

    h0 = jnp.zeros((B, H)); c0 = jnp.zeros((B, H))
    h1 = jnp.zeros((B, H)); c1 = jnp.zeros((B, H))
    ys = []
    for t in range(S):
        h0, c0 = cell(x[t], h0, c0, params["w_ih_l0"], params["w_hh_l0"],
                      params["b_ih_l0"], params["b_hh_l0"])
        h1, c1 = cell(h0, h1, c1, params["w_ih_l1"], params["w_hh_l1"],
                      params["b_ih_l1"], params["b_hh_l1"])
        ys.append(h1 @ params["w_reg"].T + params["b_reg"])
    return jnp.stack(ys, axis=0)


if __name__ == "__main__":
    # Shapes consistent with lstm_reg(input_size=4, hidden_size=32, output_size=1, num_layers=2)
    SEQ, BATCH, INPUT, HIDDEN, OUTPUT = 8, 2, 4, 32, 1

    key = jax.random.PRNGKey(0)
    k_x, k_p = jax.random.split(key)
    x = jax.random.normal(k_x, (SEQ, BATCH, INPUT), jnp.float32)
    params = init_params(k_p, INPUT, HIDDEN, OUTPUT)

    y = lstm_reg_forward(x, params)
    y = jax.block_until_ready(y)

    assert y.shape == (SEQ, BATCH, OUTPUT), y.shape

    # Tolerance loosened vs. the pure-f32 kernel: matmul operands are bf16 (f32
    # accumulation / state), and rounding error compounds through the S-step
    # recurrence.  Typical max |err| observed regime is ~1e-2.
    y_ref = _reference_forward(x, params)
    assert jnp.allclose(y, y_ref, atol=5e-2, rtol=5e-2), float(jnp.max(jnp.abs(y - y_ref)))

    print("KERNEL_OK")
</pallas_src>

<mosaic_0001>
module attributes {stable_mosaic.version = 11 : i64} {
  func.func @_lstm_reg_kernel(%arg0: memref<16x4xf32, #tpu.memory_space<vmem>>, %arg1: memref<4x128xbf16, #tpu.memory_space<vmem>>, %arg2: memref<32x128xbf16, #tpu.memory_space<vmem>>, %arg3: memref<1x128xf32, #tpu.memory_space<vmem>>, %arg4: memref<32x128xbf16, #tpu.memory_space<vmem>>, %arg5: memref<32x128xbf16, #tpu.memory_space<vmem>>, %arg6: memref<1x128xf32, #tpu.memory_space<vmem>>, %arg7: memref<32x1xf32, #tpu.memory_space<vmem>>, %arg8: memref<1x1xf32, #tpu.memory_space<vmem>>, %arg9: memref<16x1xf32, #tpu.memory_space<vmem>>, %arg10: memref<16x128xf32, #tpu.memory_space<vmem>>) attributes {dimension_semantics = [], scalar_prefetch = 0 : i64, scratch_operands = 1 : i64, tpu.core_type = #tpu.core_type<tc>} {
    %c0 = arith.constant 0 : index
    %c0_0 = arith.constant 0 : index
    %0 = vector.load %arg0[%c0, %c0_0] : memref<16x4xf32, #tpu.memory_space<vmem>>, vector<16x4xf32>
    %1 = arith.truncf %0 : vector<16x4xf32> to vector<16x4xbf16>
    %c0_1 = arith.constant 0 : index
    %c0_2 = arith.constant 0 : index
    %2 = vector.load %arg1[%c0_1, %c0_2] : memref<4x128xbf16, #tpu.memory_space<vmem>>, vector<4x128xbf16>
    %cst = arith.constant dense<0.000000e+00> : vector<16x128xf32>
    %3 = tpu.matmul %1, %2, %cst {dimension_numbers = #tpu.dot_dimension_numbers<[1], [0], [0], [1], [0, 0, 1, 1], [], []>} : vector<16x4xbf16>, vector<4x128xbf16>, vector<16x128xf32> -> vector<16x128xf32>
    %c0_3 = arith.constant 0 : index
    %c0_4 = arith.constant 0 : index
    %4 = vector.load %arg3[%c0_3, %c0_4] : memref<1x128xf32, #tpu.memory_space<vmem>>, vector<1x128xf32>
    %5 = vector.broadcast %4 : vector<1x128xf32> to vector<16x128xf32>
    %6 = arith.addf %3, %5 : vector<16x128xf32>
    %c0_5 = arith.constant 0 : index
    %c0_6 = arith.constant 0 : index
    %7 = vector.load %arg10[%c0_5, %c0_6] : memref<16x128xf32, #tpu.memory_space<vmem>>, vector<16x128xf32>
    tpu.vector_store %arg10[%c0_5, %c0_6], %6 {strides = array<i32>} : memref<16x128xf32, #tpu.memory_space<vmem>>, vector<16x128xf32>,
    %c0_7 = arith.constant 0 : index
    %c0_8 = arith.constant 0 : index
    %8 = vector.load %arg2[%c0_7, %c0_8] : memref<32x128xbf16, #tpu.memory_space<vmem>>, vector<32x128xbf16>
    %c0_9 = arith.constant 0 : index
    %c0_10 = arith.constant 0 : index
    %9 = vector.load %arg4[%c0_9, %c0_10] : memref<32x128xbf16, #tpu.memory_space<vmem>>, vector<32x128xbf16>
    %c0_11 = arith.constant 0 : index
    %c0_12 = arith.constant 0 : index
    %10 = vector.load %arg5[%c0_11, %c0_12] : memref<32x128xbf16, #tpu.memory_space<vmem>>, vector<32x128xbf16>
    %c0_13 = arith.constant 0 : index
    %c0_14 = arith.constant 0 : index
    %11 = vector.load %arg6[%c0_13, %c0_14] : memref<1x128xf32, #tpu.memory_space<vmem>>, vector<1x128xf32>
    %12 = vector.shape_cast %11 : vector<1x128xf32> to vector<1x128xf32>
    %13 = vector.broadcast %12 : vector<1x128xf32> to vector<2x128xf32>
    %cst_15 = arith.constant 0.000000e+00 : bf16
    %14 = vector.broadcast %cst_15 : bf16 to vector<2x32xbf16>
    %cst_16 = arith.constant 0.000000e+00 : f32
    %15 = vector.broadcast %cst_16 : f32 to vector<2x32xf32>
    %cst_17 = arith.constant 0.000000e+00 : bf16
    %16 = vector.broadcast %cst_17 : bf16 to vector<2x32xbf16>
    %cst_18 = arith.constant 0.000000e+00 : f32
    %17 = vector.broadcast %cst_18 : f32 to vector<2x32xf32>
    %c0_19 = arith.constant 0 : index
    %c0_20 = arith.constant 0 : index
    %18 = vector.load %arg10[%c0_19, %c0_20] : memref<16x128xf32, #tpu.memory_space<vmem>>, vector<2x128xf32>
    %cst_21 = arith.constant dense<0.000000e+00> : vector<2x128xf32>
    %19 = tpu.matmul %14, %8, %cst_21 {dimension_numbers = #tpu.dot_dimension_numbers<[1], [0], [0], [1], [0, 0, 1, 1], [], []>} : vector<2x32xbf16>, vector<32x128xbf16>, vector<2x128xf32> -> vector<2x128xf32>
    %20 = arith.addf %18, %19 : vector<2x128xf32>
    %21 = arith.negf %20 : vector<2x128xf32>
    %22 = math.exp %21 : vector<2x128xf32>
    %cst_22 = arith.constant 1.000000e+00 : f32
    %23 = vector.broadcast %cst_22 : f32 to vector<2x128xf32>
    %24 = arith.addf %23, %22 : vector<2x128xf32>
    %25 = arith.divf %23, %24 : vector<2x128xf32>
    %26 = math.tanh %20 : vector<2x128xf32>
    %27 = vector.extract_strided_slice %25 {offsets = [0, 0], sizes = [2, 32], strides = [1, 1]} : vector<2x128xf32> to vector<2x32xf32>
    %28 = vector.extract_strided_slice %25 {offsets = [0, 32], sizes = [2, 32], strides = [1, 1]} : vector<2x128xf32> to vector<2x32xf32>
    %29 = vector.extract_strided_slice %26 {offsets = [0, 64], sizes = [2, 32], strides = [1, 1]} : vector<2x128xf32> to vector<2x32xf32>
    %30 = vector.extract_strided_slice %25 {offsets = [0, 96], sizes = [2, 32], strides = [1, 1]} : vector<2x128xf32> to vector<2x32xf32>
    %31 = arith.mulf %28, %15 : vector<2x32xf32>
    %32 = arith.mulf %27, %29 : vector<2x32xf32>
    %33 = arith.addf %31, %32 : vector<2x32xf32>
    %34 = math.tanh %33 : vector<2x32xf32>
    %35 = arith.mulf %30, %34 : vector<2x32xf32>
    %36 = arith.truncf %35 : vector<2x32xf32> to vector<2x32xbf16>
    %cst_23 = arith.constant dense<0.000000e+00> : vector<2x128xf32>
    %37 = tpu.matmul %16, %10, %cst_23 {dimension_numbers = #tpu.dot_dimension_numbers<[1], [0], [0], [1], [0, 0, 1, 1], [], []>} : vector<2x32xbf16>, vector<32x128xbf16>, vector<2x128xf32> -> vector<2x128xf32>
    %cst_24 = arith.constant dense<0.000000e+00> : vector<2x128xf32>
    %38 = tpu.matmul %36, %9, %cst_24 {dimension_numbers = #tpu.dot_dimension_numbers<[1], [0], [0], [1], [0, 0, 1, 1], [], []>} : vector<2x32xbf16>, vector<32x128xbf16>, vector<2x128xf32> -> vector<2x128xf32>
    %39 = arith.addf %37, %38 : vector<2x128xf32>
    %40 = arith.addf %39, %13 : vector<2x128xf32>
    %41 = arith.negf %40 : vector<2x128xf32>
    %42 = math.exp %41 : vector<2x128xf32>
    %cst_25 = arith.constant 1.000000e+00 : f32
    %43 = vector.broadcast %cst_25 : f32 to vector<2x128xf32>
    %44 = arith.addf %43, %42 : vector<2x128xf32>
    %45 = arith.divf %43, %44 : vector<2x128xf32>
    %46 = math.tanh %40 : vector<2x128xf32>
    %47 = vector.extract_strided_slice %45 {offsets = [0, 0], sizes = [2, 32], strides = [1, 1]} : vector<2x128xf32> to vector<2x32xf32>
    %48 = vector.extract_strided_slice %45 {offsets = [0, 32], sizes = [2, 32], strides = [1, 1]} : vector<2x128xf32> to vector<2x32xf32>
    %49 = vector.extract_strided_slice %46 {offsets = [0, 64], sizes = [2, 32], strides = [1, 1]} : vector<2x128xf32> to vector<2x32xf32>
    %50 = vector.extract_strided_slice %45 {offsets = [0, 96], sizes = [2, 32], strides = [1, 1]} : vector<2x128xf32> to vector<2x32xf32>
    %51 = arith.mulf %48, %17 : vector<2x32xf32>
    %52 = arith.mulf %47, %49 : vector<2x32xf32>
    %53 = arith.addf %51, %52 : vector<2x32xf32>
    %54 = math.tanh %53 : vector<2x32xf32>
    %55 = arith.mulf %50, %54 : vector<2x32xf32>
    %56 = arith.truncf %55 : vector<2x32xf32> to vector<2x32xbf16>
    %c2 = arith.constant 2 : index
    %c0_26 = arith.constant 0 : index
    %57 = vector.load %arg10[%c2, %c0_26] : memref<16x128xf32, #tpu.memory_space<vmem>>, vector<2x128xf32>
    %cst_27 = arith.constant dense<0.000000e+00> : vector<2x128xf32>
    %58 = tpu.matmul %36, %8, %cst_27 {dimension_numbers = #tpu.dot_dimension_numbers<[1], [0], [0], [1], [0, 0, 1, 1], [], []>} : vector<2x32xbf16>, vector<32x128xbf16>, vector<2x128xf32> -> vector<2x128xf32>
    %59 = arith.addf %57, %58 : vector<2x128xf32>
    %60 = arith.negf %59 : vector<2x128xf32>
    %61 = math.exp %60 : vector<2x128xf32>
    %cst_28 = arith.constant 1.000000e+00 : f32
    %62 = vector.broadcast %cst_28 : f32 to vector<2x128xf32>
    %63 = arith.addf %62, %61 : vector<2x128xf32>
    %64 = arith.divf %62, %63 : vector<2x128xf32>
    %65 = math.tanh %59 : vector<2x128xf32>
    %66 = vector.extract_strided_slice %64 {offsets = [0, 0], sizes = [2, 32], strides = [1, 1]} : vector<2x128xf32> to vector<2x32xf32>
    %67 = vector.extract_strided_slice %64 {offsets = [0, 32], sizes = [2, 32], strides = [1, 1]} : vector<2x128xf32> to vector<2x32xf32>
    %68 = vector.extract_strided_slice %65 {offsets = [0, 64], sizes = [2, 32], strides = [1, 1]} : vector<2x128xf32> to vector<2x32xf32>
    %69 = vector.extract_strided_slice %64 {offsets = [0, 96], sizes = [2, 32], strides = [1, 1]} : vector<2x128xf32> to vector<2x32xf32>
    %70 = arith.mulf %67, %33 : vector<2x32xf32>
    %71 = arith.mulf %66, %68 : vector<2x32xf32>
    %72 = arith.addf %70, %71 : vector<2x32xf32>
    %73 = math.tanh %72 : vector<2x32xf32>
    %74 = arith.mulf %69, %73 : vector<2x32xf32>
    %75 = arith.truncf %74 : vector<2x32xf32> to vector<2x32xbf16>
    %cst_29 = arith.constant dense<0.000000e+00> : vector<2x128xf32>
    %76 = tpu.matmul %56, %10, %cst_29 {dimension_numbers = #tpu.dot_dimension_numbers<[1], [0], [0], [1], [0, 0, 1, 1], [], []>} : vector<2x32xbf16>, vector<32x128xbf16>, vector<2x128xf32> -> vector<2x128xf32>
    %cst_30 = arith.constant dense<0.000000e+00> : vector<2x128xf32>
    %77 = tpu.matmul %75, %9, %cst_30 {dimension_numbers = #tpu.dot_dimension_numbers<[1], [0], [0], [1], [0, 0, 1, 1], [], []>} : vector<2x32xbf16>, vector<32x128xbf16>, vector<2x128xf32> -> vector<2x128xf32>
    %78 = arith.addf %76, %77 : vector<2x128xf32>
    %79 = arith.addf %78, %13 : vector<2x128xf32>
    %80 = arith.negf %79 : vector<2x128xf32>
    %81 = math.exp %80 : vector<2x128xf32>
    %cst_31 = arith.constant 1.000000e+00 : f32
    %82 = vector.broadcast %cst_31 : f32 to vector<2x128xf32>
    %83 = arith.addf %82, %81 : vector<2x128xf32>
    %84 = arith.divf %82, %83 : vector<2x128xf32>
    %85 = math.tanh %79 : vector<2x128xf32>
    %86 = vector.extract_strided_slice %84 {offsets = [0, 0], sizes = [2, 32], strides = [1, 1]} : vector<2x128xf32> to vector<2x32xf32>
    %87 = vector.extract_strided_slice %84 {offsets = [0, 32], sizes = [2, 32], strides = [1, 1]} : vector<2x128xf32> to vector<2x32xf32>
    %88 = vector.extract_strided_slice %85 {offsets = [0, 64], sizes = [2, 32], strides = [1, 1]} : vector<2x128xf32> to vector<2x32xf32>
    %89 = vector.extract_strided_slice %84 {offsets = [0, 96], sizes = [2, 32], strides = [1, 1]} : vector<2x128xf32> to vector<2x32xf32>
    %90 = arith.mulf %87, %53 : vector<2x32xf32>
    %91 = arith.mulf %86, %88 : vector<2x32xf32>
    %92 = arith.addf %90, %91 : vector<2x32xf32>
    %93 = math.tanh %92 : vector<2x32xf32>
    %94 = arith.mulf %89, %93 : vector<2x32xf32>
    %95 = arith.truncf %94 : vector<2x32xf32> to vector<2x32xbf16>
    %c4 = arith.constant 4 : index
    %c0_32 = arith.constant 0 : index
    %96 = vector.load %arg10[%c4, %c0_32] : memref<16x128xf32, #tpu.memory_space<vmem>>, vector<2x128xf32>
    %cst_33 = arith.constant dense<0.000000e+00> : vector<2x128xf32>
    %97 = tpu.matmul %75, %8, %cst_33 {dimension_numbers = #tpu.dot_dimension_numbers<[1], [0], [0], [1], [0, 0, 1, 1], [], []>} : vector<2x32xbf16>, vector<32x128xbf16>, vector<2x128xf32> -> vector<2x128xf32>
    %98 = arith.addf %96, %97 : vector<2x128xf32>
    %99 = arith.negf %98 : vector<2x128xf32>
    %100 = math.exp %99 : vector<2x128xf32>
    %cst_34 = arith.constant 1.000000e+00 : f32
    %101 = vector.broadcast %cst_34 : f32 to vector<2x128xf32>
    %102 = arith.addf %101, %100 : vector<2x128xf32>
    %103 = arith.divf %101, %102 : vector<2x128xf32>
    %104 = math.tanh %98 : vector<2x128xf32>
    %105 = vector.extract_strided_slice %103 {offsets = [0, 0], sizes = [2, 32], strides = [1, 1]} : vector<2x128xf32> to vector<2x32xf32>
    %106 = vector.extract_strided_slice %103 {offsets = [0, 32], sizes = [2, 32], strides = [1, 1]} : vector<2x128xf32> to vector<2x32xf32>
    %107 = vector.extract_strided_slice %104 {offsets = [0, 64], sizes = [2, 32], strides = [1, 1]} : vector<2x128xf32> to vector<2x32xf32>
    %108 = vector.extract_strided_slice %103 {offsets = [0, 96], sizes = [2, 32], strides = [1, 1]} : vector<2x128xf32> to vector<2x32xf32>
    %109 = arith.mulf %106, %72 : vector<2x32xf32>
    %110 = arith.mulf %105, %107 : vector<2x32xf32>
    %111 = arith.addf %109, %110 : vector<2x32xf32>
    %112 = math.tanh %111 : vector<2x32xf32>
    %113 = arith.mulf %108, %112 : vector<2x32xf32>
    %114 = arith.truncf %113 : vector<2x32xf32> to vector<2x32xbf16>
    %cst_35 = arith.constant dense<0.000000e+00> : vector<2x128xf32>
    %115 = tpu.matmul %95, %10, %cst_35 {dimension_numbers = #tpu.dot_dimension_numbers<[1], [0], [0], [1], [0, 0, 1, 1], [], []>} : vector<2x32xbf16>, vector<32x128xbf16>, vector<2x128xf32> -> vector<2x128xf32>
    %cst_36 = arith.constant dense<0.000000e+00> : vector<2x128xf32>
    %116 = tpu.matmul %114, %9, %cst_36 {dimension_numbers = #tpu.dot_dimension_numbers<[1], [0], [0], [1], [0, 0, 1, 1], [], []>} : vector<2x32xbf16>, vector<32x128xbf16>, vector<2x128xf32> -> vector<2x128xf32>
    %117 = arith.addf %115, %116 : vector<2x128xf32>
    %118 = arith.addf %117, %13 : vector<2x128xf32>
    %119 = arith.negf %118 : vector<2x128xf32>
    %120 = math.exp %119 : vector<2x128xf32>
    %cst_37 = arith.constant 1.000000e+00 : f32
    %121 = vector.broadcast %cst_37 : f32 to vector<2x128xf32>
    %122 = arith.addf %121, %120 : vector<2x128xf32>
    %123 = arith.divf %121, %122 : vector<2x128xf32>
    %124 = math.tanh %118 : vector<2x128xf32>
    %125 = vector.extract_strided_slice %123 {offsets = [0, 0], sizes = [2, 32], strides = [1, 1]} : vector<2x128xf32> to vector<2x32xf32>
    %126 = vector.extract_strided_slice %123 {offsets = [0, 32], sizes = [2, 32], strides = [1, 1]} : vector<2x128xf32> to vector<2x32xf32>
    %127 = vector.extract_strided_slice %124 {offsets = [0, 64], sizes = [2, 32], strides = [1, 1]} : vector<2x128xf32> to vector<2x32xf32>
    %128 = vector.extract_strided_slice %123 {offsets = [0, 96], sizes = [2, 32], strides = [1, 1]} : vector<2x128xf32> to vector<2x32xf32>
    %129 = arith.mulf %126, %92 : vector<2x32xf32>
    %130 = arith.mulf %125, %127 : vector<2x32xf32>
    %131 = arith.addf %129, %130 : vector<2x32xf32>
    %132 = math.tanh %131 : vector<2x32xf32>
    %133 = arith.mulf %128, %132 : vector<2x32xf32>
    %134 = arith.truncf %133 : vector<2x32xf32> to vector<2x32xbf16>
    %c6 = arith.constant 6 : index
    %c0_38 = arith.constant 0 : index
    %135 = vector.load %arg10[%c6, %c0_38] : memref<16x128xf32, #tpu.memory_space<vmem>>, vector<2x128xf32>
    %cst_39 = arith.constant dense<0.000000e+00> : vector<2x128xf32>
    %136 = tpu.matmul %114, %8, %cst_39 {dimension_numbers = #tpu.dot_dimension_numbers<[1], [0], [0], [1], [0, 0, 1, 1], [], []>} : vector<2x32xbf16>, vector<32x128xbf16>, vector<2x128xf32> -> vector<2x128xf32>
    %137 = arith.addf %135, %136 : vector<2x128xf32>
    %138 = arith.negf %137 : vector<2x128xf32>
    %139 = math.exp %138 : vector<2x128xf32>
    %cst_40 = arith.constant 1.000000e+00 : f32
    %140 = vector.broadcast %cst_40 : f32 to vector<2x128xf32>
    %141 = arith.addf %140, %139 : vector<2x128xf32>
    %142 = arith.divf %140, %141 : vector<2x128xf32>
    %143 = math.tanh %137 : vector<2x128xf32>
    %144 = vector.extract_strided_slice %142 {offsets = [0, 0], sizes = [2, 32], strides = [1, 1]} : vector<2x128xf32> to vector<2x32xf32>
    %145 = vector.extract_strided_slice %142 {offsets = [0, 32], sizes = [2, 32], strides = [1, 1]} : vector<2x128xf32> to vector<2x32xf32>
    %146 = vector.extract_strided_slice %143 {offsets = [0, 64], sizes = [2, 32], strides = [1, 1]} : vector<2x128xf32> to vector<2x32xf32>
    %147 = vector.extract_strided_slice %142 {offsets = [0, 96], sizes = [2, 32], strides = [1, 1]} : vector<2x128xf32> to vector<2x32xf32>
    %148 = arith.mulf %145, %111 : vector<2x32xf32>
    %149 = arith.mulf %144, %146 : vector<2x32xf32>
    %150 = arith.addf %148, %149 : vector<2x32xf32>
    %151 = math.tanh %150 : vector<2x32xf32>
    %152 = arith.mulf %147, %151 : vector<2x32xf32>
    %153 = arith.truncf %152 : vector<2x32xf32> to vector<2x32xbf16>
    %cst_41 = arith.constant dense<0.000000e+00> : vector<2x128xf32>
    %154 = tpu.matmul %134, %10, %cst_41 {dimension_numbers = #tpu.dot_dimension_numbers<[1], [0], [0], [1], [0, 0, 1, 1], [], []>} : vector<2x32xbf16>, vector<32x128xbf16>, vector<2x128xf32> -> vector<2x128xf32>
    %cst_42 = arith.constant dense<0.000000e+00> : vector<2x128xf32>
    %155 = tpu.matmul %153, %9, %cst_42 {dimension_numbers = #tpu.dot_dimension_numbers<[1], [0], [0], [1], [0, 0, 1, 1], [], []>} : vector<2x32xbf16>, vector<32x128xbf16>, vector<2x128xf32> -> vector<2x128xf32>
    %156 = arith.addf %154, %155 : vector<2x128xf32>
    %157 = arith.addf %156, %13 : vector<2x128xf32>
    %158 = arith.negf %157 : vector<2x128xf32>
    %159 = math.exp %158 : vector<2x128xf32>
    %cst_43 = arith.constant 1.000000e+00 : f32
    %160 = vector.broadcast %cst_43 : f32 to vector<2x128xf32>
    %161 = arith.addf %160, %159 : vector<2x128xf32>
    %162 = arith.divf %160, %161 : vector<2x128xf32>
    %163 = math.tanh %157 : vector<2x128xf32>
    %164 = vector.extract_strided_slice %162 {offsets = [0, 0], sizes = [2, 32], strides = [1, 1]} : vector<2x128xf32> to vector<2x32xf32>
    %165 = vector.extract_strided_slice %162 {offsets = [0, 32], sizes = [2, 32], strides = [1, 1]} : vector<2x128xf32> to vector<2x32xf32>
    %166 = vector.extract_strided_slice %163 {offsets = [0, 64], sizes = [2, 32], strides = [1, 1]} : vector<2x128xf32> to vector<2x32xf32>
    %167 = vector.extract_strided_slice %162 {offsets = [0, 96], sizes = [2, 32], strides = [1, 1]} : vector<2x128xf32> to vector<2x32xf32>
    %168 = arith.mulf %165, %131 : vector<2x32xf32>
    %169 = arith.mulf %164, %166 : vector<2x32xf32>
    %170 = arith.addf %168, %169 : vector<2x32xf32>
    %171 = math.tanh %170 : vector<2x32xf32>
    %172 = arith.mulf %167, %171 : vector<2x32xf32>
    %173 = arith.truncf %172 : vector<2x32xf32> to vector<2x32xbf16>
    %c8 = arith.constant 8 : index
    %c0_44 = arith.constant 0 : index
    %174 = vector.load %arg10[%c8, %c0_44] : memref<16x128xf32, #tpu.memory_space<vmem>>, vector<2x128xf32>
    %cst_45 = arith.constant dense<0.000000e+00> : vector<2x128xf32>
    %175 = tpu.matmul %153, %8, %cst_45 {dimension_numbers = #tpu.dot_dimension_numbers<[1], [0], [0], [1], [0, 0, 1, 1], [], []>} : vector<2x32xbf16>, vector<32x128xbf16>, vector<2x128xf32> -> vector<2x128xf32>
    %176 = arith.addf %174, %175 : vector<2x128xf32>
    %177 = arith.negf %176 : vector<2x128xf32>
    %178 = math.exp %177 : vector<2x128xf32>
    %cst_46 = arith.constant 1.000000e+00 : f32
    %179 = vector.broadcast %cst_46 : f32 to vector<2x128xf32>
    %180 = arith.addf %179, %178 : vector<2x128xf32>
    %181 = arith.divf %179, %180 : vector<2x128xf32>
    %182 = math.tanh %176 : vector<2x128xf32>
    %183 = vector.extract_strided_slice %181 {offsets = [0, 0], sizes = [2, 32], strides = [1, 1]} : vector<2x128xf32> to vector<2x32xf32>
    %184 = vector.extract_strided_slice %181 {offsets = [0, 32], sizes = [2, 32], strides = [1, 1]} : vector<2x128xf32> to vector<2x32xf32>
    %185 = vector.extract_strided_slice %182 {offsets = [0, 64], sizes = [2, 32], strides = [1, 1]} : vector<2x128xf32> to vector<2x32xf32>
    %186 = vector.extract_strided_slice %181 {offsets = [0, 96], sizes = [2, 32], strides = [1, 1]} : vector<2x128xf32> to vector<2x32xf32>
    %187 = arith.mulf %184, %150 : vector<2x32xf32>
    %188 = arith.mulf %183, %185 : vector<2x32xf32>
    %189 = arith.addf %187, %188 : vector<2x32xf32>
    %190 = math.tanh %189 : vector<2x32xf32>
    %191 = arith.mulf %186, %190 : vector<2x32xf32>
    %192 = arith.truncf %191 : vector<2x32xf32> to vector<2x32xbf16>
    %cst_47 = arith.constant dense<0.000000e+00> : vector<2x128xf32>
    %193 = tpu.matmul %173, %10, %cst_47 {dimension_numbers = #tpu.dot_dimension_numbers<[1], [0], [0], [1], [0, 0, 1, 1], [], []>} : vector<2x32xbf16>, vector<32x128xbf16>, vector<2x128xf32> -> vector<2x128xf32>
    %cst_48 = arith.constant dense<0.000000e+00> : vector<2x128xf32>
    %194 = tpu.matmul %192, %9, %cst_48 {dimension_numbers = #tpu.dot_dimension_numbers<[1], [0], [0], [1], [0, 0, 1, 1], [], []>} : vector<2x32xbf16>, vector<32x128xbf16>, vector<2x128xf32> -> vector<2x128xf32>
    %195 = arith.addf %193, %194 : vector<2x128xf32>
    %196 = arith.addf %195, %13 : vector<2x128xf32>
    %197 = arith.negf %196 : vector<2x128xf32>
    %198 = math.exp %197 : vector<2x128xf32>
    %cst_49 = arith.constant 1.000000e+00 : f32
    %199 = vector.broadcast %cst_49 : f32 to vector<2x128xf32>
    %200 = arith.addf %199, %198 : vector<2x128xf32>
    %201 = arith.divf %199, %200 : vector<2x128xf32>
    %202 = math.tanh %196 : vector<2x128xf32>
    %203 = vector.extract_strided_slice %201 {offsets = [0, 0], sizes = [2, 32], strides = [1, 1]} : vector<2x128xf32> to vector<2x32xf32>
    %204 = vector.extract_strided_slice %201 {offsets = [0, 32], sizes = [2, 32], strides = [1, 1]} : vector<2x128xf32> to vector<2x32xf32>
    %205 = vector.extract_strided_slice %202 {offsets = [0, 64], sizes = [2, 32], strides = [1, 1]} : vector<2x128xf32> to vector<2x32xf32>
    %206 = vector.extract_strided_slice %201 {offsets = [0, 96], sizes = [2, 32], strides = [1, 1]} : vector<2x128xf32> to vector<2x32xf32>
    %207 = arith.mulf %204, %170 : vector<2x32xf32>
    %208 = arith.mulf %203, %205 : vector<2x32xf32>
    %209 = arith.addf %207, %208 : vector<2x32xf32>
    %210 = math.tanh %209 : vector<2x32xf32>
    %211 = arith.mulf %206, %210 : vector<2x32xf32>
    %212 = arith.truncf %211 : vector<2x32xf32> to vector<2x32xbf16>
    %c10 = arith.constant 10 : index
    %c0_50 = arith.constant 0 : index
    %213 = vector.load %arg10[%c10, %c0_50] : memref<16x128xf32, #tpu.memory_space<vmem>>, vector<2x128xf32>
    %cst_51 = arith.constant dense<0.000000e+00> : vector<2x128xf32>
    %214 = tpu.matmul %192, %8, %cst_51 {dimension_numbers = #tpu.dot_dimension_numbers<[1], [0], [0], [1], [0, 0, 1, 1], [], []>} : vector<2x32xbf16>, vector<32x128xbf16>, vector<2x128xf32> -> vector<2x128xf32>
    %215 = arith.addf %213, %214 : vector<2x128xf32>
    %216 = arith.negf %215 : vector<2x128xf32>
    %217 = math.exp %216 : vector<2x128xf32>
    %cst_52 = arith.constant 1.000000e+00 : f32
    %218 = vector.broadcast %cst_52 : f32 to vector<2x128xf32>
    %219 = arith.addf %218, %217 : vector<2x128xf32>
    %220 = arith.divf %218, %219 : vector<2x128xf32>
    %221 = math.tanh %215 : vector<2x128xf32>
    %222 = vector.extract_strided_slice %220 {offsets = [0, 0], sizes = [2, 32], strides = [1, 1]} : vector<2x128xf32> to vector<2x32xf32>
    %223 = vector.extract_strided_slice %220 {offsets = [0, 32], sizes = [2, 32], strides = [1, 1]} : vector<2x128xf32> to vector<2x32xf32>
    %224 = vector.extract_strided_slice %221 {offsets = [0, 64], sizes = [2, 32], strides = [1, 1]} : vector<2x128xf32> to vector<2x32xf32>
    %225 = vector.extract_strided_slice %220 {offsets = [0, 96], sizes = [2, 32], strides = [1, 1]} : vector<2x128xf32> to vector<2x32xf32>
    %226 = arith.mulf %223, %189 : vector<2x32xf32>
    %227 = arith.mulf %222, %224 : vector<2x32xf32>
    %228 = arith.addf %226, %227 : vector<2x32xf32>
    %229 = math.tanh %228 : vector<2x32xf32>
    %230 = arith.mulf %225, %229 : vector<2x32xf32>
    %231 = arith.truncf %230 : vector<2x32xf32> to vector<2x32xbf16>
    %cst_53 = arith.constant dense<0.000000e+00> : vector<2x128xf32>
    %232 = tpu.matmul %212, %10, %cst_53 {dimension_numbers = #tpu.dot_dimension_numbers<[1], [0], [0], [1], [0, 0, 1, 1], [], []>} : vector<2x32xbf16>, vector<32x128xbf16>, vector<2x128xf32> -> vector<2x128xf32>
    %cst_54 = arith.constant dense<0.000000e+00> : vector<2x128xf32>
    %233 = tpu.matmul %231, %9, %cst_54 {dimension_numbers = #tpu.dot_dimension_numbers<[1], [0], [0], [1], [0, 0, 1, 1], [], []>} : vector<2x32xbf16>, vector<32x128xbf16>, vector<2x128xf32> -> vector<2x128xf32>
    %234 = arith.addf %232, %233 : vector<2x128xf32>
    %235 = arith.addf %234, %13 : vector<2x128xf32>
    %236 = arith.negf %235 : vector<2x128xf32>
    %237 = math.exp %236 : vector<2x128xf32>
    %cst_55 = arith.constant 1.000000e+00 : f32
    %238 = vector.broadcast %cst_55 : f32 to vector<2x128xf32>
    %239 = arith.addf %238, %237 : vector<2x128xf32>
    %240 = arith.divf %238, %239 : vector<2x128xf32>
    %241 = math.tanh %235 : vector<2x128xf32>
    %242 = vector.extract_strided_slice %240 {offsets = [0, 0], sizes = [2, 32], strides = [1, 1]} : vector<2x128xf32> to vector<2x32xf32>
    %243 = vector.extract_strided_slice %240 {offsets = [0, 32], sizes = [2, 32], strides = [1, 1]} : vector<2x128xf32> to vector<2x32xf32>
    %244 = vector.extract_strided_slice %241 {offsets = [0, 64], sizes = [2, 32], strides = [1, 1]} : vector<2x128xf32> to vector<2x32xf32>
    %245 = vector.extract_strided_slice %240 {offsets = [0, 96], sizes = [2, 32], strides = [1, 1]} : vector<2x128xf32> to vector<2x32xf32>
    %246 = arith.mulf %243, %209 : vector<2x32xf32>
    %247 = arith.mulf %242, %244 : vector<2x32xf32>
    %248 = arith.addf %246, %247 : vector<2x32xf32>
    %249 = math.tanh %248 : vector<2x32xf32>
    %250 = arith.mulf %245, %249 : vector<2x32xf32>
    %251 = arith.truncf %250 : vector<2x32xf32> to vector<2x32xbf16>
    %c12 = arith.constant 12 : index
    %c0_56 = arith.constant 0 : index
    %252 = vector.load %arg10[%c12, %c0_56] : memref<16x128xf32, #tpu.memory_space<vmem>>, vector<2x128xf32>
    %cst_57 = arith.constant dense<0.000000e+00> : vector<2x128xf32>
    %253 = tpu.matmul %231, %8, %cst_57 {dimension_numbers = #tpu.dot_dimension_numbers<[1], [0], [0], [1], [0, 0, 1, 1], [], []>} : vector<2x32xbf16>, vector<32x128xbf16>, vector<2x128xf32> -> vector<2x128xf32>
    %254 = arith.addf %252, %253 : vector<2x128xf32>
    %255 = arith.negf %254 : vector<2x128xf32>
    %256 = math.exp %255 : vector<2x128xf32>
    %cst_58 = arith.constant 1.000000e+00 : f32
    %257 = vector.broadcast %cst_58 : f32 to vector<2x128xf32>
    %258 = arith.addf %257, %256 : vector<2x128xf32>
    %259 = arith.divf %257, %258 : vector<2x128xf32>
    %260 = math.tanh %254 : vector<2x128xf32>
    %261 = vector.extract_strided_slice %259 {offsets = [0, 0], sizes = [2, 32], strides = [1, 1]} : vector<2x128xf32> to vector<2x32xf32>
    %262 = vector.extract_strided_slice %259 {offsets = [0, 32], sizes = [2, 32], strides = [1, 1]} : vector<2x128xf32> to vector<2x32xf32>
    %263 = vector.extract_strided_slice %260 {offsets = [0, 64], sizes = [2, 32], strides = [1, 1]} : vector<2x128xf32> to vector<2x32xf32>
    %264 = vector.extract_strided_slice %259 {offsets = [0, 96], sizes = [2, 32], strides = [1, 1]} : vector<2x128xf32> to vector<2x32xf32>
    %265 = arith.mulf %262, %228 : vector<2x32xf32>
    %266 = arith.mulf %261, %263 : vector<2x32xf32>
    %267 = arith.addf %265, %266 : vector<2x32xf32>
    %268 = math.tanh %267 : vector<2x32xf32>
    %269 = arith.mulf %264, %268 : vector<2x32xf32>
    %270 = arith.truncf %269 : vector<2x32xf32> to vector<2x32xbf16>
    %cst_59 = arith.constant dense<0.000000e+00> : vector<2x128xf32>
    %271 = tpu.matmul %251, %10, %cst_59 {dimension_numbers = #tpu.dot_dimension_numbers<[1], [0], [0], [1], [0, 0, 1, 1], [], []>} : vector<2x32xbf16>, vector<32x128xbf16>, vector<2x128xf32> -> vector<2x128xf32>
    %cst_60 = arith.constant dense<0.000000e+00> : vector<2x128xf32>
    %272 = tpu.matmul %270, %9, %cst_60 {dimension_numbers = #tpu.dot_dimension_numbers<[1], [0], [0], [1], [0, 0, 1, 1], [], []>} : vector<2x32xbf16>, vector<32x128xbf16>, vector<2x128xf32> -> vector<2x128xf32>
    %273 = arith.addf %271, %272 : vector<2x128xf32>
    %274 = arith.addf %273, %13 : vector<2x128xf32>
    %275 = arith.negf %274 : vector<2x128xf32>
    %276 = math.exp %275 : vector<2x128xf32>
    %cst_61 = arith.constant 1.000000e+00 : f32
    %277 = vector.broadcast %cst_61 : f32 to vector<2x128xf32>
    %278 = arith.addf %277, %276 : vector<2x128xf32>
    %279 = arith.divf %277, %278 : vector<2x128xf32>
    %280 = math.tanh %274 : vector<2x128xf32>
    %281 = vector.extract_strided_slice %279 {offsets = [0, 0], sizes = [2, 32], strides = [1, 1]} : vector<2x128xf32> to vector<2x32xf32>
    %282 = vector.extract_strided_slice %279 {offsets = [0, 32], sizes = [2, 32], strides = [1, 1]} : vector<2x128xf32> to vector<2x32xf32>
    %283 = vector.extract_strided_slice %280 {offsets = [0, 64], sizes = [2, 32], strides = [1, 1]} : vector<2x128xf32> to vector<2x32xf32>
    %284 = vector.extract_strided_slice %279 {offsets = [0, 96], sizes = [2, 32], strides = [1, 1]} : vector<2x128xf32> to vector<2x32xf32>
    %285 = arith.mulf %282, %248 : vector<2x32xf32>
    %286 = arith.mulf %281, %283 : vector<2x32xf32>
    %287 = arith.addf %285, %286 : vector<2x32xf32>
    %288 = math.tanh %287 : vector<2x32xf32>
    %289 = arith.mulf %284, %288 : vector<2x32xf32>
    %290 = arith.truncf %289 : vector<2x32xf32> to vector<2x32xbf16>
    %c14 = arith.constant 14 : index
    %c0_62 = arith.constant 0 : index
    %291 = vector.load %arg10[%c14, %c0_62] : memref<16x128xf32, #tpu.memory_space<vmem>>, vector<2x128xf32>
    %cst_63 = arith.constant dense<0.000000e+00> : vector<2x128xf32>
    %292 = tpu.matmul %270, %8, %cst_63 {dimension_numbers = #tpu.dot_dimension_numbers<[1], [0], [0], [1], [0, 0, 1, 1], [], []>} : vector<2x32xbf16>, vector<32x128xbf16>, vector<2x128xf32> -> vector<2x128xf32>
    %293 = arith.addf %291, %292 : vector<2x128xf32>
    %294 = arith.negf %293 : vector<2x128xf32>
    %295 = math.exp %294 : vector<2x128xf32>
    %cst_64 = arith.constant 1.000000e+00 : f32
    %296 = vector.broadcast %cst_64 : f32 to vector<2x128xf32>
    %297 = arith.addf %296, %295 : vector<2x128xf32>
    %298 = arith.divf %296, %297 : vector<2x128xf32>
    %299 = math.tanh %293 : vector<2x128xf32>
    %300 = vector.extract_strided_slice %298 {offsets = [0, 0], sizes = [2, 32], strides = [1, 1]} : vector<2x128xf32> to vector<2x32xf32>
    %301 = vector.extract_strided_slice %298 {offsets = [0, 32], sizes = [2, 32], strides = [1, 1]} : vector<2x128xf32> to vector<2x32xf32>
    %302 = vector.extract_strided_slice %299 {offsets = [0, 64], sizes = [2, 32], strides = [1, 1]} : vector<2x128xf32> to vector<2x32xf32>
    %303 = vector.extract_strided_slice %298 {offsets = [0, 96], sizes = [2, 32], strides = [1, 1]} : vector<2x128xf32> to vector<2x32xf32>
    %304 = arith.mulf %301, %267 : vector<2x32xf32>
    %305 = arith.mulf %300, %302 : vector<2x32xf32>
    %306 = arith.addf %304, %305 : vector<2x32xf32>
    %307 = math.tanh %306 : vector<2x32xf32>
    %308 = arith.mulf %303, %307 : vector<2x32xf32>
    %309 = arith.truncf %308 : vector<2x32xf32> to vector<2x32xbf16>
    %cst_65 = arith.constant dense<0.000000e+00> : vector<2x128xf32>
    %310 = tpu.matmul %290, %10, %cst_65 {dimension_numbers = #tpu.dot_dimension_numbers<[1], [0], [0], [1], [0, 0, 1, 1], [], []>} : vector<2x32xbf16>, vector<32x128xbf16>, vector<2x128xf32> -> vector<2x128xf32>
    %cst_66 = arith.constant dense<0.000000e+00> : vector<2x128xf32>
    %311 = tpu.matmul %309, %9, %cst_66 {dimension_numbers = #tpu.dot_dimension_numbers<[1], [0], [0], [1], [0, 0, 1, 1], [], []>} : vector<2x32xbf16>, vector<32x128xbf16>, vector<2x128xf32> -> vector<2x128xf32>
    %312 = arith.addf %310, %311 : vector<2x128xf32>
    %313 = arith.addf %312, %13 : vector<2x128xf32>
    %314 = arith.negf %313 : vector<2x128xf32>
    %315 = math.exp %314 : vector<2x128xf32>
    %cst_67 = arith.constant 1.000000e+00 : f32
    %316 = vector.broadcast %cst_67 : f32 to vector<2x128xf32>
    %317 = arith.addf %316, %315 : vector<2x128xf32>
    %318 = arith.divf %316, %317 : vector<2x128xf32>
    %319 = math.tanh %313 : vector<2x128xf32>
    %320 = vector.extract_strided_slice %318 {offsets = [0, 0], sizes = [2, 32], strides = [1, 1]} : vector<2x128xf32> to vector<2x32xf32>
    %321 = vector.extract_strided_slice %318 {offsets = [0, 32], sizes = [2, 32], strides = [1, 1]} : vector<2x128xf32> to vector<2x32xf32>
    %322 = vector.extract_strided_slice %319 {offsets = [0, 64], sizes = [2, 32], strides = [1, 1]} : vector<2x128xf32> to vector<2x32xf32>
    %323 = vector.extract_strided_slice %318 {offsets = [0, 96], sizes = [2, 32], strides = [1, 1]} : vector<2x128xf32> to vector<2x32xf32>
    %324 = arith.mulf %321, %287 : vector<2x32xf32>
    %325 = arith.mulf %320, %322 : vector<2x32xf32>
    %326 = arith.addf %324, %325 : vector<2x32xf32>
    %327 = math.tanh %326 : vector<2x32xf32>
    %328 = arith.mulf %323, %327 : vector<2x32xf32>
    %329 = tpu.concatenate %55, %94, %133, %172, %211, %250, %289, %328 in 0 : vector<2x32xf32>, vector<2x32xf32>, vector<2x32xf32>, vector<2x32xf32>, vector<2x32xf32>, vector<2x32xf32>, vector<2x32xf32>, vector<2x32xf32> -> vector<16x32xf32>
    %c0_68 = arith.constant 0 : index
    %c0_69 = arith.constant 0 : index
    %330 = vector.load %arg7[%c0_68, %c0_69] : memref<32x1xf32, #tpu.memory_space<vmem>>, vector<32x1xf32>
    %cst_70 = arith.constant dense<0.000000e+00> : vector<16x1xf32>
    %331 = tpu.matmul %329, %330, %cst_70 {dimension_numbers = #tpu.dot_dimension_numbers<[1], [0], [0], [1], [0, 0, 1, 1], [], []>} : vector<16x32xf32>, vector<32x1xf32>, vector<16x1xf32> -> vector<16x1xf32>
    %c0_71 = arith.constant 0 : index
    %c0_72 = arith.constant 0 : index
    %332 = vector.load %arg8[%c0_71, %c0_72] : memref<1x1xf32, #tpu.memory_space<vmem>>, vector<1x1xf32>
    %333 = vector.broadcast %332 : vector<1x1xf32> to vector<16x1xf32>
    %334 = arith.addf %331, %333 : vector<16x1xf32>
    %c0_73 = arith.constant 0 : index
    %c0_74 = arith.constant 0 : index
    %335 = vector.load %arg9[%c0_73, %c0_74] : memref<16x1xf32, #tpu.memory_space<vmem>>, vector<16x1xf32>
    tpu.vector_store %arg9[%c0_73, %c0_74], %334 {strides = array<i32>} : memref<16x1xf32, #tpu.memory_space<vmem>>, vector<16x1xf32>,
    return
  }
}

</mosaic_0001>

<bundles_post_ra>
// kernel: lstm_reg_forward.1
= control target key start
LH: loop header
LB: loop body
LE: loop exit
PB: predicated region body
PF: predicated region fallthrough
CT: control target
= control target key end

     0   :  { %vm50_vm0 = vcmask 1041408   ;;  %v2251_v0 = vmov 0.0   ;;  %vm2252_vm1 = vmmov 0   ;;  %vm46_vm2 = vcmask 31744   ;;  %s2254_s19 = smov 64   ;;  %s2717_s1 = inlined_call_operand.vmem [shape: bf16[4,128], index: 1, kind: input, shape index: {}]   ;;  %s2718_s0 = inlined_call_operand.vmem [shape: f32[16,4], index: 0, kind: input, shape index: {}]   ;;  %s2719_s2 = inlined_call_operand.vmem [shape: bf16[32,128], index: 2, kind: input, shape index: {}]   ;;  %s2720_s3 = inlined_call_operand.vmem [shape: f32[1,128], index: 3, kind: input, shape index: {}]   ;;  %s2721_s4 = inlined_call_operand.vmem [shape: bf16[32,128], index: 4, kind: input, shape index: {}]   ;;  %s2722_s5 = inlined_call_operand.vmem [shape: bf16[32,128], index: 5, kind: input, shape index: {}]   ;;  %s2723_s6 = inlined_call_operand.vmem [shape: f32[1,128], index: 6, kind: input, shape index: {}]   ;;  %s2724_s7 = inlined_call_operand.vmem [shape: f32[32,1], index: 7, kind: input, shape index: {}]   ;;  %s2725_s8 = inlined_call_operand.<no memory space> [shape: f32[1,1], index: 8, kind: input, shape index: {}]   ;;  %s2726_s9 = inlined_call_operand.vmem [shape: f32[16,1], index: 9, kind: output, shape index: {}]  }
   0x1   :  { %1888 = vmatprep.subr.bf16.mxu0 %v2251_v0  ;;  %v38_v1 = vld [vmem:[%s2717_s1] sm:$0x3]  ;;  %1890 = vmatprep.mubr.msk.bf16.mxu0 %vm2252_vm1, %v2251_v0  ;;  %v36_v3 = vld [vmem:[%s2718_s0 + $0x8] sm:$0xff]  ;;  %v2253_v8 = vmov 0   ;;  %vm129_vm3 = vcmask 261120   ;;  %vm1648_vm4 = vcmask 1043456  }
   0x2   :  { %v35_v2 = vld [vmem:[%s2718_s0] sm:$0xff]  ;;  %v52_v4 = vsel %vm50_vm0, %v38_v1, 0  ;;  %1894 = vmatprep.subr.bf16.mxu1 %v2251_v0  ;;  %1898 = vmatprep.mubr.msk.bf16.mxu1 %vm2252_vm1, %v2251_v0  ;;  %v2331_v7 = vld [vmem:[%s2719_s2 + $0x8] sm:$0xff]   ;;  %vm1650_vm5 = vcmask 1045504   ;;  %vm1751_vm6 = vcmask 7168  }
   0x3   :  { %v37_v5 = vpack.c.bf16 %v36_v3, %v35_v2  ;;  %v2323_v6 = vld [vmem:[%s2719_s2] sm:$0xff]   ;;  %1889 = vmatpush3.bf16.msra.mxu0 %v52_v4  ;;  %v2363_v34 = vld [vmem:[%s2721_s4 + $0x8] sm:$0xff]  }
   0x4   :  { %1895 = vmatpush3.bf16.msra.mxu1 %v2323_v6  ;;  %1902 = vmatprep.subr.bf16.mxu0 %v2251_v0  ;;  %v1758_v9 = vld [vmem:[%s2720_s3] ss:$0 sm:$0xff]  ;;  %s2255_s3 = smov 32   ;;  %v2370_v35 = vld [vmem:[%s2722_s5 + $0x8] sm:$0xff]  }
   0x5   :  { %1896 = vmatprep.subr.bf16.mxu1 %v2251_v0  ;;  %v2352_v32 = vld [vmem:[%s2721_s4] sm:$0xff]  }
   0x6   :  { %1891 = vmatmul.mubr.msk.bf16.vlgmr.msra.gmra.mrb[0].mxu0 %vm46_vm2, %v37_v5  ;;  %v2357_v33 = vld [vmem:[%s2722_s5] sm:$0xff]  }
   0x7   :  { %1906 = vmatprep.mubr.msk.bf16.mxu0 %vm2252_vm1, %v2251_v0  ;;  %1903 = vmatpush3.bf16.msra.mxu0 %v2352_v32  ;;  %v2402_v46 = vld [vmem:[%s2723_s6] ss:$0 sm:$0xff] }
   0x8   :  { %1897 = vmatpush3.bf16.msra.mxu1 %v2331_v7  ;;  %1904 = vmatprep.subr.bf16.mxu0 %v2251_v0 }
   0x9   :  { %1910 = vmatprep.subr.bf16.mxu1 %v2251_v0 }
   0xb   :  { %1899 = vmatmul.mubr.bf16.vlgmr.msra.gmra.mrb[0].mxu1 %v2253_v8  ;;  %1905 = vmatpush3.bf16.msra.mxu0 %v2363_v34 }
   0xc   :  { %1914 = vmatprep.mubr.msk.bf16.mxu1 %vm2252_vm1, %v2251_v0  ;;  %1911 = vmatpush3.bf16.msra.mxu1 %v2357_v33 }
   0xd   :  { %1912 = vmatprep.subr.bf16.mxu1 %v2251_v0  ;;  %1918 = vmatprep.subr.bf16.mxu0 %v2251_v0 }
  0x10   :  { %1913 = vmatpush3.bf16.msra.mxu1 %v2370_v35 }
  0x11   :  { %1926 = vmatprep.subr.bf16.mxu1 %v2251_v0 }
  0x13   :  { %1915 = vmatmul.mubr.bf16.vlgmr.msra.gmra.mrb[4].mxu1 %v2253_v8 }
  0x14   :  { %1927 = vmatpush3.bf16.msra.mxu1 %v2352_v32  ;;  %1930 = vmatprep.mubr.msk.bf16.mxu1 %vm2252_vm1, %v2251_v0 }
  0x15   :  { %1928 = vmatprep.subr.bf16.mxu1 %v2251_v0 }
  0x18   :  { %1929 = vmatpush3.bf16.msra.mxu1 %v2363_v34 }
  0x19   :  { %1942 = vmatprep.subr.bf16.mxu1 %v2251_v0 }
  0xd9   :  { %v88_v10 = vpop.f32.mrb[0].mxu0 }
  0xda   :  { %v89_v11 = vadd.f32 %v1758_v9, %v88_v10  ;;  %v1892_v12 = vpop.f32.mrb[1].mxu0 }
  0xdb   :  { %v91_v13 = vpop.f32.mrb[2].mxu0 }
  0xdc   :  { %95 = vst [vmem:[#allocation2] sm:$0xff] %v89_v11  ;;  %v92_v14 = vadd.f32 %v1758_v9, %v91_v13  ;;  %v1893_v15 = vpop.f32.mrb[3].mxu0 }
  0xde   :  { %96 = vst [vmem:[#allocation2 + $0x8] sm:$0xff] %v92_v14  ;;  %v167_v16 = vpop.f32.mrb[0].mxu1 }
  0xdf   :  { %v1900_v17 = vpop.f32.mrb[1].mxu1 }
  0xe0   :  { %v170_v18 = vpop.f32.mrb[2].mxu1 }
  0xe1   :  { %v1901_v19 = vpop.f32.mrb[3].mxu1 }
  0xe3   :  { %v116_v20 = vld [vmem:[#allocation2] sm:$0x3]  ;;  %v335_v52 = vld [vmem:[#allocation2 + $0x2] sm:$0x3] }
  0xe4   :  { %v173_v21 = vadd.f32 %v167_v16, %v116_v20 }
  0xe6   :  { %2116 = vtanh.f32 %v173_v21  ;;  %v1763_v23 = vmul.f32 -1.442695, %v173_v21  ;;  %v303_v41 = vpop.f32.mrb[4].mxu1 }
  0xe7   :  { %v1916_v42 = vpop.f32.mrb[5].mxu1 }
  0xe8   :  { %2118 = vpow2.f32 %v1763_v23  ;;  %v306_v43 = vpop.f32.mrb[6].mxu1 }
  0xe9   :  { %v1917_v44 = vpop.f32.mrb[7].mxu1 }
  0xf0   :  { %v2117_v22 = vpop.eup %2116 }
  0xf1   :  { %183 = vrot.lane.b32.xlu0 %v2117_v22, %s2254_s19 }
  0xf2   :  { %v2119_v24 = vpop.eup %2118 }
  0xf3   :  { %v177_v25 = vadd.f32 1.0, %v2119_v24 }
  0xf5   :  { %2120 = vrcp.f32 %v177_v25 }
  0xff   :  { %v2121_v26 = vpop.eup %2120 }
 0x100   :  { %v181_v29 = vmul.f32 0.0, %v2121_v26 }
 0x163   :  { %v184_v27 = vpop.permute.xlu0 %183 }
 0x164   :  { %v186_v28 = vmul.f32 %v2121_v26, %v184_v27 }
 0x166   :  { %188 = vrot.lane.b32.xlu0 %v186_v28, %s2255_s3 }
 0x1d8   :  { %v189_v30 = vpop.permute.xlu0 %188 }
 0x1d9   :  { %v2346_v31 = vadd.f32 %v189_v30, %v181_v29 }
 0x1db   :  { %2122 = vtanh.f32 %v2346_v31 }
 0x1e5   :  { %v2123_v36 = vpop.eup %2122 }
 0x1e6   :  { %194 = vrot.lane.b32.xlu1 %v2123_v36, %s2254_s19 }
 0x258   :  { %v195_v37 = vpop.permute.xlu1 %194 }
 0x259   :  { %v197_v38 = vmul.f32 %v2121_v26, %v195_v37 }
 0x25b   :  { %v198_v39 = vpack.c.bf16 %v197_v38, %v197_v38 }
 0x25d   :  { %200 = vrot.lane.b32.xlu1 %v198_v39, %s2255_s3 }
 0x2cf   :  { %v201_v40 = vpop.permute.xlu1 %200 }
 0x2d0   :  { %1907 = vmatmul.mubr.msk.bf16.vlgmr.msra.gmra.mrb[4].mxu0 %vm129_vm3, %v201_v40 }
 0x2d1   :  { %1919 = vmatpush3.bf16.msra.mxu0 %v2323_v6  ;;  %1922 = vmatprep.mubr.msk.bf16.mxu0 %vm2252_vm1, %v2251_v0 }
 0x2d2   :  { %1920 = vmatprep.subr.bf16.mxu0 %v2251_v0 }
 0x2d5   :  { %1921 = vmatpush3.bf16.msra.mxu0 %v2331_v7 }
 0x2d6   :  { %1934 = vmatprep.subr.bf16.mxu0 %v2251_v0 }
 0x2d8   :  { %1923 = vmatmul.mubr.msk.bf16.vlgmr.msra.gmra.mrb[8].mxu0 %vm129_vm3, %v201_v40 }
 0x2d9   :  { %1935 = vmatpush3.bf16.msra.mxu0 %v2357_v33  ;;  %1938 = vmatprep.mubr.msk.bf16.mxu0 %vm2252_vm1, %v2251_v0 }
 0x2da   :  { %1936 = vmatprep.subr.bf16.mxu0 %v2251_v0 }
 0x2dd   :  { %1937 = vmatpush3.bf16.msra.mxu0 %v2370_v35 }
 0x2de   :  { %1950 = vmatprep.subr.bf16.mxu0 %v2251_v0 }
 0x3a3   :  { %v251_v45 = vpop.f32.mrb[4].mxu0 }
 0x3a4   :  { %v304_v47 = vadd.f32 %v303_v41, %v251_v45  ;;  %v1908_v48 = vpop.f32.mrb[5].mxu0  ;;  %v520_v41 = vld [vmem:[#allocation2 + $0x4] sm:$0x3] }
 0x3a5   :  { %v254_v49 = vpop.f32.mrb[6].mxu0 }
 0x3a6   :  { %v309_v50 = vadd.f32 %v2402_v46, %v304_v47  ;;  %v1909_v51 = vpop.f32.mrb[7].mxu0 }
 0x3a8   :  { %2124 = vtanh.f32 %v309_v50  ;;  %v1769_v60 = vmul.f32 -1.442695, %v309_v50 }
 0x3ab   :  { %v370_v53 = vpop.f32.mrb[8].mxu0 }
 0x3ac   :  { %v376_v54 = vadd.f32 %v370_v53, %v335_v52  ;;  %v1924_v55 = vpop.f32.mrb[9].mxu0 }
 0x3ad   :  { %v373_v56 = vpop.f32.mrb[10].mxu0 }
 0x3ae   :  { %2126 = vtanh.f32 %v376_v54  ;;  %v1925_v57 = vpop.f32.mrb[11].mxu0  ;;  %v1771_v61 = vmul.f32 -1.442695, %v376_v54 }
 0x3af   :  { %2128 = vpow2.f32 %v1769_v60 }
 0x3b0   :  { %2130 = vpow2.f32 %v1771_v61 }
 0x3b2   :  { %v2125_v58 = vpop.eup %2124 }
 0x3b3   :  { %319 = vrot.lane.b32.xlu1 %v2125_v58, %s2254_s19 }
 0x3b8   :  { %v2127_v59 = vpop.eup %2126 }
 0x3b9   :  { %386 = vrot.lane.b32.xlu0 %v2127_v59, %s2254_s19  ;;  %v2129_v62 = vpop.eup %2128 }
 0x3ba   :  { %v313_v63 = vadd.f32 1.0, %v2129_v62  ;;  %v2131_v1 = vpop.eup %2130 }
 0x3bb   :  { %v380_v2 = vadd.f32 1.0, %v2131_v1 }
 0x3bc   :  { %2132 = vrcp.f32 %v313_v63 }
 0x3bd   :  { %2134 = vrcp.f32 %v380_v2 }
 0x3c6   :  { %v2133_v3 = vpop.eup %2132 }
 0x3c7   :  { %v2135_v8 = vpop.eup %2134  ;;  %v317_v11 = vmul.f32 0.0, %v2133_v3 }
 0x3c8   :  { %v384_v14 = vmul.f32 %v2135_v8, %v2346_v31 }
 0x425   :  { %v320_v4 = vpop.permute.xlu1 %319 }
 0x426   :  { %v322_v5 = vmul.f32 %v2133_v3, %v320_v4 }
 0x428   :  { %324 = vrot.lane.b32.xlu1 %v322_v5, %s2255_s3 }
 0x42b   :  { %v387_v9 = vpop.permute.xlu0 %386 }
 0x42c   :  { %v389_v10 = vmul.f32 %v2135_v8, %v387_v9 }
 0x42e   :  { %391 = vrot.lane.b32.xlu0 %v389_v10, %s2255_s3 }
 0x49a   :  { %v325_v12 = vpop.permute.xlu1 %324 }
 0x49b   :  { %v2409_v13 = vadd.f32 %v325_v12, %v317_v11 }
 0x49d   :  { %2136 = vtanh.f32 %v2409_v13 }
 0x4a0   :  { %v392_v15 = vpop.permute.xlu0 %391 }
 0x4a1   :  { %v2413_v16 = vadd.f32 %v392_v15, %v384_v14 }
 0x4a3   :  { %2138 = vtanh.f32 %v2413_v16 }
 0x4a7   :  { %v2137_v17 = vpop.eup %2136 }
 0x4a8   :  { %330 = vrot.lane.b32.xlu1 %v2137_v17, %s2254_s19 }
 0x4ad   :  { %v2139_v18 = vpop.eup %2138 }
 0x4ae   :  { %397 = vrot.lane.b32.xlu0 %v2139_v18, %s2254_s19 }
 0x51a   :  { %v331_v19 = vpop.permute.xlu1 %330 }
 0x51b   :  { %v2418_v20 = vmul.f32 %v2133_v3, %v331_v19 }
 0x51d   :  { %v334_v21 = vpack.c.bf16 %v2418_v20, %v2418_v20 }
 0x51f   :  { %449 = vrot.lane.b32.xlu1 %v334_v21, %s2255_s3 }
 0x520   :  { %v398_v22 = vpop.permute.xlu0 %397 }
 0x521   :  { %v400_v23 = vmul.f32 %v2135_v8, %v398_v22 }
 0x523   :  { %v401_v24 = vpack.c.bf16 %v400_v23, %v400_v23 }
 0x525   :  { %403 = vrot.lane.b32.xlu0 %v401_v24, %s2255_s3 }
 0x591   :  { %v450_v25 = vpop.permute.xlu1 %449 }
 0x592   :  { %1939 = vmatmul.mubr.msk.bf16.vlgmr.msra.gmra.mrb[12].mxu0 %vm129_vm3, %v450_v25 }
 0x593   :  { %1951 = vmatpush3.bf16.msra.mxu0 %v2352_v32  ;;  %1954 = vmatprep.mubr.msk.bf16.mxu0 %vm2252_vm1, %v2251_v0 }
 0x594   :  { %1952 = vmatprep.subr.bf16.mxu0 %v2251_v0 }
 0x597   :  { %v404_v26 = vpop.permute.xlu0 %403  ;;  %1953 = vmatpush3.bf16.msra.mxu0 %v2363_v34 }
 0x598   :  { %1931 = vmatmul.mubr.msk.bf16.vlgmr.msra.gmra.mrb[8].mxu1 %vm129_vm3, %v404_v26  ;;  %1966 = vmatprep.subr.bf16.mxu0 %v2251_v0 }
 0x599   :  { %1943 = vmatpush3.bf16.msra.mxu1 %v2323_v6  ;;  %1946 = vmatprep.mubr.msk.bf16.mxu1 %vm2252_vm1, %v2251_v0 }
 0x59a   :  { %1944 = vmatprep.subr.bf16.mxu1 %v2251_v0 }
 0x59d   :  { %1945 = vmatpush3.bf16.msra.mxu1 %v2331_v7 }
 0x59e   :  { %1958 = vmatprep.subr.bf16.mxu1 %v2251_v0 }
 0x5a0   :  { %1947 = vmatmul.mubr.msk.bf16.vlgmr.msra.gmra.mrb[12].mxu1 %vm129_vm3, %v404_v26 }
 0x5a1   :  { %1959 = vmatpush3.bf16.msra.mxu1 %v2357_v33  ;;  %1962 = vmatprep.mubr.msk.bf16.mxu1 %vm2252_vm1, %v2251_v0 }
 0x5a2   :  { %1960 = vmatprep.subr.bf16.mxu1 %v2251_v0 }
 0x5a5   :  { %1961 = vmatpush3.bf16.msra.mxu1 %v2370_v35 }
 0x5a6   :  { %1974 = vmatprep.subr.bf16.mxu1 %v2251_v0 }
 0x665   :  { %v488_v27 = vpop.f32.mrb[12].mxu0 }
 0x666   :  { %v1940_v28 = vpop.f32.mrb[13].mxu0 }
 0x667   :  { %v491_v29 = vpop.f32.mrb[14].mxu0  ;;  %v705_v28 = vld [vmem:[#allocation2 + $0x6] sm:$0x3] }
 0x668   :  { %v1941_v30 = vpop.f32.mrb[15].mxu0 }
 0x66b   :  { %v442_v31 = vpop.f32.mrb[8].mxu1 }
 0x66c   :  { %v489_v36 = vadd.f32 %v488_v27, %v442_v31  ;;  %v1932_v37 = vpop.f32.mrb[9].mxu1 }
 0x66d   :  { %v445_v38 = vpop.f32.mrb[10].mxu1 }
 0x66e   :  { %v494_v39 = vadd.f32 %v2402_v46, %v489_v36  ;;  %v1933_v40 = vpop.f32.mrb[11].mxu1 }
 0x670   :  { %2140 = vtanh.f32 %v494_v39  ;;  %v1774_v50 = vmul.f32 -1.442695, %v494_v39 }
 0x673   :  { %v555_v42 = vpop.f32.mrb[12].mxu1 }
 0x674   :  { %v561_v43 = vadd.f32 %v555_v42, %v520_v41  ;;  %v1948_v44 = vpop.f32.mrb[13].mxu1 }
 0x675   :  { %v558_v45 = vpop.f32.mrb[14].mxu1 }
 0x676   :  { %2142 = vtanh.f32 %v561_v43  ;;  %v1949_v47 = vpop.f32.mrb[15].mxu1  ;;  %v1776_v51 = vmul.f32 -1.442695, %v561_v43 }
 0x677   :  { %2144 = vpow2.f32 %v1774_v50 }
 0x678   :  { %2146 = vpow2.f32 %v1776_v51 }
 0x67a   :  { %v2141_v48 = vpop.eup %2140 }
 0x67b   :  { %504 = vrot.lane.b32.xlu1 %v2141_v48, %s2254_s19 }
 0x680   :  { %v2143_v49 = vpop.eup %2142 }
 0x681   :  { %571 = vrot.lane.b32.xlu0 %v2143_v49, %s2254_s19  ;;  %v2145_v52 = vpop.eup %2144 }
 0x682   :  { %v498_v53 = vadd.f32 1.0, %v2145_v52  ;;  %v2147_v54 = vpop.eup %2146 }
 0x683   :  { %v565_v55 = vadd.f32 1.0, %v2147_v54 }
 0x684   :  { %2148 = vrcp.f32 %v498_v53 }
 0x685   :  { %2150 = vrcp.f32 %v565_v55 }
 0x68e   :  { %v2149_v56 = vpop.eup %2148 }
 0x68f   :  { %v2151_v59 = vpop.eup %2150  ;;  %v502_v62 = vmul.f32 %v2149_v56, %v2409_v13 }
 0x690   :  { %v569_v2 = vmul.f32 %v2151_v59, %v2413_v16 }
 0x6ed   :  { %v505_v57 = vpop.permute.xlu1 %504 }
 0x6ee   :  { %v507_v58 = vmul.f32 %v2149_v56, %v505_v57 }
 0x6f0   :  { %509 = vrot.lane.b32.xlu1 %v507_v58, %s2255_s3 }
 0x6f3   :  { %v572_v60 = vpop.permute.xlu0 %571 }
 0x6f4   :  { %v574_v61 = vmul.f32 %v2151_v59, %v572_v60 }
 0x6f6   :  { %576 = vrot.lane.b32.xlu0 %v574_v61, %s2255_s3 }
 0x762   :  { %v510_v63 = vpop.permute.xlu1 %509 }
 0x763   :  { %v2451_v1 = vadd.f32 %v510_v63, %v502_v62 }
 0x765   :  { %2152 = vtanh.f32 %v2451_v1 }
 0x768   :  { %v577_v3 = vpop.permute.xlu0 %576 }
 0x769   :  { %v2455_v4 = vadd.f32 %v577_v3, %v569_v2 }
 0x76b   :  { %2154 = vtanh.f32 %v2455_v4 }
 0x76f   :  { %v2153_v5 = vpop.eup %2152 }
 0x770   :  { %515 = vrot.lane.b32.xlu1 %v2153_v5, %s2254_s19 }
 0x775   :  { %v2155_v8 = vpop.eup %2154 }
 0x776   :  { %582 = vrot.lane.b32.xlu0 %v2155_v8, %s2254_s19 }
 0x7e2   :  { %v516_v9 = vpop.permute.xlu1 %515 }
 0x7e3   :  { %v2460_v10 = vmul.f32 %v2149_v56, %v516_v9 }
 0x7e5   :  { %v519_v11 = vpack.c.bf16 %v2460_v10, %v2460_v10  ;;  %v1630_v61 = vrot.slane %v2460_v10, 6 }
 0x7e7   :  { %634 = vrot.lane.b32.xlu1 %v519_v11, %s2255_s3  ;;  %v1647_v3 = vsel %vm50_vm0, %v2418_v20, %v1630_v61 }
 0x7e8   :  { %v583_v12 = vpop.permute.xlu0 %582 }
 0x7e9   :  { %v585_v13 = vmul.f32 %v2151_v59, %v583_v12 }
 0x7eb   :  { %v586_v14 = vpack.c.bf16 %v585_v13, %v585_v13 }
 0x7ed   :  { %588 = vrot.lane.b32.xlu0 %v586_v14, %s2255_s3 }
 0x859   :  { %v635_v15 = vpop.permute.xlu1 %634 }
 0x85a   :  { %1963 = vmatmul.mubr.msk.bf16.vlgmr.msra.gmra.mrb[16].mxu1 %vm129_vm3, %v635_v15 }
 0x85b   :  { %1975 = vmatpush3.bf16.msra.mxu1 %v2352_v32  ;;  %1978 = vmatprep.mubr.msk.bf16.mxu1 %vm2252_vm1, %v2251_v0 }
 0x85c   :  { %1976 = vmatprep.subr.bf16.mxu1 %v2251_v0 }
 0x85f   :  { %v589_v16 = vpop.permute.xlu0 %588  ;;  %1977 = vmatpush3.bf16.msra.mxu1 %v2363_v34 }
 0x860   :  { %1955 = vmatmul.mubr.msk.bf16.vlgmr.msra.gmra.mrb[16].mxu0 %vm129_vm3, %v589_v16  ;;  %1990 = vmatprep.subr.bf16.mxu1 %v2251_v0 }
 0x861   :  { %1967 = vmatpush3.bf16.msra.mxu0 %v2323_v6  ;;  %1970 = vmatprep.mubr.msk.bf16.mxu0 %vm2252_vm1, %v2251_v0 }
 0x862   :  { %1968 = vmatprep.subr.bf16.mxu0 %v2251_v0 }
 0x865   :  { %1969 = vmatpush3.bf16.msra.mxu0 %v2331_v7 }
 0x866   :  { %1982 = vmatprep.subr.bf16.mxu0 %v2251_v0 }
 0x868   :  { %1971 = vmatmul.mubr.msk.bf16.vlgmr.msra.gmra.mrb[20].mxu0 %vm129_vm3, %v589_v16 }
 0x869   :  { %1983 = vmatpush3.bf16.msra.mxu0 %v2357_v33  ;;  %1986 = vmatprep.mubr.msk.bf16.mxu0 %vm2252_vm1, %v2251_v0 }
 0x86a   :  { %1984 = vmatprep.subr.bf16.mxu0 %v2251_v0 }
 0x86d   :  { %1985 = vmatpush3.bf16.msra.mxu0 %v2370_v35 }
 0x86e   :  { %1998 = vmatprep.subr.bf16.mxu0 %v2251_v0 }
 0x92d   :  { %v673_v17 = vpop.f32.mrb[16].mxu1 }
 0x92e   :  { %v1964_v18 = vpop.f32.mrb[17].mxu1 }
 0x92f   :  { %v676_v19 = vpop.f32.mrb[18].mxu1 }
 0x930   :  { %v1965_v21 = vpop.f32.mrb[19].mxu1 }
 0x933   :  { %v627_v22 = vpop.f32.mrb[16].mxu0 }
 0x934   :  { %v674_v23 = vadd.f32 %v673_v17, %v627_v22  ;;  %v1956_v24 = vpop.f32.mrb[17].mxu0  ;;  %v890_v22 = vld [vmem:[#allocation2 + $0x8] sm:$0x3] }
 0x935   :  { %v630_v25 = vpop.f32.mrb[18].mxu0 }
 0x936   :  { %v679_v26 = vadd.f32 %v2402_v46, %v674_v23  ;;  %v1957_v27 = vpop.f32.mrb[19].mxu0 }
 0x938   :  { %2156 = vtanh.f32 %v679_v26  ;;  %v1779_v40 = vmul.f32 -1.442695, %v679_v26 }
 0x93b   :  { %v740_v29 = vpop.f32.mrb[20].mxu0 }
 0x93c   :  { %v746_v30 = vadd.f32 %v740_v29, %v705_v28  ;;  %v1972_v31 = vpop.f32.mrb[21].mxu0 }
 0x93d   :  { %v743_v36 = vpop.f32.mrb[22].mxu0 }
 0x93e   :  { %2158 = vtanh.f32 %v746_v30  ;;  %v1973_v37 = vpop.f32.mrb[23].mxu0  ;;  %v1781_v41 = vmul.f32 -1.442695, %v746_v30 }
 0x93f   :  { %2160 = vpow2.f32 %v1779_v40 }
 0x940   :  { %2162 = vpow2.f32 %v1781_v41 }
 0x942   :  { %v2157_v38 = vpop.eup %2156 }
 0x943   :  { %689 = vrot.lane.b32.xlu1 %v2157_v38, %s2254_s19 }
 0x948   :  { %v2159_v39 = vpop.eup %2158 }
 0x949   :  { %756 = vrot.lane.b32.xlu0 %v2159_v39, %s2254_s19  ;;  %v2161_v42 = vpop.eup %2160 }
 0x94a   :  { %v683_v43 = vadd.f32 1.0, %v2161_v42  ;;  %v2163_v44 = vpop.eup %2162 }
 0x94b   :  { %v750_v45 = vadd.f32 1.0, %v2163_v44 }
 0x94c   :  { %2164 = vrcp.f32 %v683_v43 }
 0x94d   :  { %2166 = vrcp.f32 %v750_v45 }
 0x956   :  { %v2165_v47 = vpop.eup %2164 }
 0x957   :  { %v2167_v50 = vpop.eup %2166  ;;  %v687_v53 = vmul.f32 %v2165_v47, %v2451_v1 }
 0x958   :  { %v754_v56 = vmul.f32 %v2167_v50, %v2455_v4 }
 0x9b5   :  { %v690_v48 = vpop.permute.xlu1 %689 }
 0x9b6   :  { %v692_v49 = vmul.f32 %v2165_v47, %v690_v48 }
 0x9b8   :  { %694 = vrot.lane.b32.xlu1 %v692_v49, %s2255_s3 }
 0x9bb   :  { %v757_v51 = vpop.permute.xlu0 %756 }
 0x9bc   :  { %v759_v52 = vmul.f32 %v2167_v50, %v757_v51 }
 0x9be   :  { %761 = vrot.lane.b32.xlu0 %v759_v52, %s2255_s3 }
 0xa2a   :  { %v695_v54 = vpop.permute.xlu1 %694 }
 0xa2b   :  { %v2493_v55 = vadd.f32 %v695_v54, %v687_v53 }
 0xa2d   :  { %2168 = vtanh.f32 %v2493_v55 }
 0xa30   :  { %v762_v57 = vpop.permute.xlu0 %761 }
 0xa31   :  { %v2497_v58 = vadd.f32 %v762_v57, %v754_v56 }
 0xa33   :  { %2170 = vtanh.f32 %v2497_v58 }
 0xa37   :  { %v2169_v59 = vpop.eup %2168 }
 0xa38   :  { %700 = vrot.lane.b32.xlu1 %v2169_v59, %s2254_s19 }
 0xa3d   :  { %v2171_v60 = vpop.eup %2170 }
 0xa3e   :  { %767 = vrot.lane.b32.xlu0 %v2171_v60, %s2254_s19 }
 0xaaa   :  { %v701_v62 = vpop.permute.xlu1 %700 }
 0xaab   :  { %v703_v63 = vmul.f32 %v2165_v47, %v701_v62 }
 0xaad   :  { %v704_v1 = vpack.c.bf16 %v703_v63, %v703_v63  ;;  %v1633_v2 = vrot.slane %v703_v63, 4 }
 0xaaf   :  { %819 = vrot.lane.b32.xlu1 %v704_v1, %s2255_s3  ;;  %v2507_v4 = vsel %vm1648_vm4, %v1647_v3, %v1633_v2 }
 0xab0   :  { %v768_v5 = vpop.permute.xlu0 %767 }
 0xab1   :  { %v770_v8 = vmul.f32 %v2167_v50, %v768_v5 }
 0xab3   :  { %v771_v9 = vpack.c.bf16 %v770_v8, %v770_v8 }
 0xab5   :  { %773 = vrot.lane.b32.xlu0 %v771_v9, %s2255_s3 }
 0xb21   :  { %v820_v11 = vpop.permute.xlu1 %819 }
 0xb22   :  { %1987 = vmatmul.mubr.msk.bf16.vlgmr.msra.gmra.mrb[24].mxu0 %vm129_vm3, %v820_v11 }
 0xb23   :  { %1999 = vmatpush3.bf16.msra.mxu0 %v2352_v32  ;;  %2002 = vmatprep.mubr.msk.bf16.mxu0 %vm2252_vm1, %v2251_v0 }
 0xb24   :  { %2000 = vmatprep.subr.bf16.mxu0 %v2251_v0 }
 0xb27   :  { %v774_v20 = vpop.permute.xlu0 %773  ;;  %2001 = vmatpush3.bf16.msra.mxu0 %v2363_v34 }
 0xb28   :  { %1979 = vmatmul.mubr.msk.bf16.vlgmr.msra.gmra.mrb[20].mxu1 %vm129_vm3, %v774_v20  ;;  %2014 = vmatprep.subr.bf16.mxu0 %v2251_v0 }
 0xb29   :  { %1991 = vmatpush3.bf16.msra.mxu1 %v2323_v6  ;;  %1994 = vmatprep.mubr.msk.bf16.mxu1 %vm2252_vm1, %v2251_v0 }
 0xb2a   :  { %1992 = vmatprep.subr.bf16.mxu1 %v2251_v0 }
 0xb2d   :  { %1993 = vmatpush3.bf16.msra.mxu1 %v2331_v7 }
 0xb2e   :  { %2006 = vmatprep.subr.bf16.mxu1 %v2251_v0 }
 0xb30   :  { %1995 = vmatmul.mubr.msk.bf16.vlgmr.msra.gmra.mrb[24].mxu1 %vm129_vm3, %v774_v20 }
 0xb31   :  { %2007 = vmatpush3.bf16.msra.mxu1 %v2357_v33  ;;  %2010 = vmatprep.mubr.msk.bf16.mxu1 %vm2252_vm1, %v2251_v0 }
 0xb32   :  { %2008 = vmatprep.subr.bf16.mxu1 %v2251_v0 }
 0xb35   :  { %2009 = vmatpush3.bf16.msra.mxu1 %v2370_v35 }
 0xb36   :  { %2022 = vmatprep.subr.bf16.mxu1 %v2251_v0 }
 0xbf5   :  { %v858_v10 = vpop.f32.mrb[24].mxu0 }
 0xbf6   :  { %v1988_v12 = vpop.f32.mrb[25].mxu0 }
 0xbf7   :  { %v861_v13 = vpop.f32.mrb[26].mxu0 }
 0xbf8   :  { %v1989_v14 = vpop.f32.mrb[27].mxu0  ;;  %v1075_v13 = vld [vmem:[#allocation2 + $0xa] sm:$0x3] }
 0xbfb   :  { %v812_v15 = vpop.f32.mrb[20].mxu1 }
 0xbfc   :  { %v859_v16 = vadd.f32 %v858_v10, %v812_v15  ;;  %v1980_v17 = vpop.f32.mrb[21].mxu1 }
 0xbfd   :  { %v815_v18 = vpop.f32.mrb[22].mxu1 }
 0xbfe   :  { %v864_v19 = vadd.f32 %v2402_v46, %v859_v16  ;;  %v1981_v21 = vpop.f32.mrb[23].mxu1 }
 0xc00   :  { %2172 = vtanh.f32 %v864_v19  ;;  %v1784_v30 = vmul.f32 -1.442695, %v864_v19 }
 0xc03   :  { %v925_v23 = vpop.f32.mrb[24].mxu1 }
 0xc04   :  { %v931_v24 = vadd.f32 %v925_v23, %v890_v22  ;;  %v1996_v25 = vpop.f32.mrb[25].mxu1 }
 0xc05   :  { %v928_v26 = vpop.f32.mrb[26].mxu1 }
 0xc06   :  { %2174 = vtanh.f32 %v931_v24  ;;  %v1997_v27 = vpop.f32.mrb[27].mxu1  ;;  %v1786_v31 = vmul.f32 -1.442695, %v931_v24 }
 0xc07   :  { %2176 = vpow2.f32 %v1784_v30 }
 0xc08   :  { %2178 = vpow2.f32 %v1786_v31 }
 0xc0a   :  { %v2173_v28 = vpop.eup %2172 }
 0xc0b   :  { %874 = vrot.lane.b32.xlu1 %v2173_v28, %s2254_s19 }
 0xc10   :  { %v2175_v29 = vpop.eup %2174 }
 0xc11   :  { %941 = vrot.lane.b32.xlu0 %v2175_v29, %s2254_s19  ;;  %v2177_v36 = vpop.eup %2176 }
 0xc12   :  { %v868_v37 = vadd.f32 1.0, %v2177_v36  ;;  %v2179_v38 = vpop.eup %2178 }
 0xc13   :  { %v935_v39 = vadd.f32 1.0, %v2179_v38 }
 0xc14   :  { %2180 = vrcp.f32 %v868_v37 }
 0xc15   :  { %2182 = vrcp.f32 %v935_v39 }
 0xc1e   :  { %v2181_v40 = vpop.eup %2180 }
 0xc1f   :  { %v2183_v43 = vpop.eup %2182  ;;  %v872_v47 = vmul.f32 %v2181_v40, %v2493_v55 }
 0xc20   :  { %v939_v50 = vmul.f32 %v2183_v43, %v2497_v58 }
 0xc7d   :  { %v875_v41 = vpop.permute.xlu1 %874 }
 0xc7e   :  { %v877_v42 = vmul.f32 %v2181_v40, %v875_v41 }
 0xc80   :  { %879 = vrot.lane.b32.xlu1 %v877_v42, %s2255_s3 }
 0xc83   :  { %v942_v44 = vpop.permute.xlu0 %941 }
 0xc84   :  { %v944_v45 = vmul.f32 %v2183_v43, %v942_v44 }
 0xc86   :  { %946 = vrot.lane.b32.xlu0 %v944_v45, %s2255_s3 }
 0xcf2   :  { %v880_v48 = vpop.permute.xlu1 %879 }
 0xcf3   :  { %v2537_v49 = vadd.f32 %v880_v48, %v872_v47 }
 0xcf5   :  { %2184 = vtanh.f32 %v2537_v49 }
 0xcf8   :  { %v947_v51 = vpop.permute.xlu0 %946 }
 0xcf9   :  { %v2541_v52 = vadd.f32 %v947_v51, %v939_v50 }
 0xcfb   :  { %2186 = vtanh.f32 %v2541_v52 }
 0xcff   :  { %v2185_v53 = vpop.eup %2184 }
 0xd00   :  { %885 = vrot.lane.b32.xlu1 %v2185_v53, %s2254_s19 }
 0xd05   :  { %v2187_v54 = vpop.eup %2186 }
 0xd06   :  { %952 = vrot.lane.b32.xlu0 %v2187_v54, %s2254_s19 }
 0xd72   :  { %v886_v56 = vpop.permute.xlu1 %885 }
 0xd73   :  { %v888_v55 = vmul.f32 %v2181_v40, %v886_v56 }
 0xd75   :  { %v889_v57 = vpack.c.bf16 %v888_v55, %v888_v55  ;;  %v1636_v59 = vrot.slane %v888_v55, 2 }
 0xd77   :  { %1004 = vrot.lane.b32.xlu1 %v889_v57, %s2255_s3  ;;  %v2549_v58 = vsel %vm1650_vm5, %v2507_v4, %v1636_v59 }
 0xd78   :  { %v953_v60 = vpop.permute.xlu0 %952 }
 0xd79   :  { %v955_v61 = vmul.f32 %v2183_v43, %v953_v60 }
 0xd7b   :  { %v956_v62 = vpack.c.bf16 %v955_v61, %v955_v61  ;;  %v1260_v61 = vld [vmem:[#allocation2 + $0xc] sm:$0x3] }
 0xd7d   :  { %958 = vrot.lane.b32.xlu0 %v956_v62, %s2255_s3 }
 0xde9   :  { %v1005_v63 = vpop.permute.xlu1 %1004 }
 0xdea   :  { %2011 = vmatmul.mubr.msk.bf16.vlgmr.msra.gmra.mrb[28].mxu1 %vm129_vm3, %v1005_v63 }
 0xdeb   :  { %2023 = vmatpush3.bf16.msra.mxu1 %v2352_v32  ;;  %2026 = vmatprep.mubr.msk.bf16.mxu1 %vm2252_vm1, %v2251_v0 }
 0xdec   :  { %2024 = vmatprep.subr.bf16.mxu1 %v2251_v0 }
 0xdef   :  { %v959_v1 = vpop.permute.xlu0 %958  ;;  %2025 = vmatpush3.bf16.msra.mxu1 %v2363_v34 }
 0xdf0   :  { %2003 = vmatmul.mubr.msk.bf16.vlgmr.msra.gmra.mrb[28].mxu0 %vm129_vm3, %v959_v1  ;;  %2038 = vmatprep.subr.bf16.mxu1 %v2251_v0 }
 0xdf1   :  { %2015 = vmatpush3.bf16.msra.mxu0 %v2323_v6  ;;  %2018 = vmatprep.mubr.msk.bf16.mxu0 %vm2252_vm1, %v2251_v0 }
 0xdf2   :  { %2016 = vmatprep.subr.bf16.mxu0 %v2251_v0 }
 0xdf5   :  { %2017 = vmatpush3.bf16.msra.mxu0 %v2331_v7 }
 0xdf6   :  { %2030 = vmatprep.subr.bf16.mxu0 %v2251_v0 }
 0xdf8   :  { %2019 = vmatmul.mubr.msk.bf16.vlgmr.msra.gmra.mrb[32].mxu0 %vm129_vm3, %v959_v1 }
 0xdf9   :  { %2031 = vmatpush3.bf16.msra.mxu0 %v2357_v33  ;;  %2034 = vmatprep.mubr.msk.bf16.mxu0 %vm2252_vm1, %v2251_v0 }
 0xdfa   :  { %2032 = vmatprep.subr.bf16.mxu0 %v2251_v0 }
 0xdfd   :  { %2033 = vmatpush3.bf16.msra.mxu0 %v2370_v35 }
 0xdfe   :  { %2046 = vmatprep.subr.bf16.mxu0 %v2251_v0 }
 0xebd   :  { %v1043_v2 = vpop.f32.mrb[28].mxu1 }
 0xebe   :  { %v2012_v3 = vpop.f32.mrb[29].mxu1 }
 0xebf   :  { %v1046_v4 = vpop.f32.mrb[30].mxu1 }
 0xec0   :  { %v2013_v5 = vpop.f32.mrb[31].mxu1 }
 0xec3   :  { %v997_v8 = vpop.f32.mrb[28].mxu0 }
 0xec4   :  { %v1044_v9 = vadd.f32 %v1043_v2, %v997_v8  ;;  %v2004_v11 = vpop.f32.mrb[29].mxu0 }
 0xec5   :  { %v1000_v20 = vpop.f32.mrb[30].mxu0 }
 0xec6   :  { %v1049_v10 = vadd.f32 %v2402_v46, %v1044_v9  ;;  %v2005_v12 = vpop.f32.mrb[31].mxu0 }
 0xec8   :  { %2188 = vtanh.f32 %v1049_v10  ;;  %v1789_v22 = vmul.f32 -1.442695, %v1049_v10 }
 0xecb   :  { %v1110_v14 = vpop.f32.mrb[32].mxu0 }
 0xecc   :  { %v1116_v15 = vadd.f32 %v1110_v14, %v1075_v13  ;;  %v2020_v16 = vpop.f32.mrb[33].mxu0 }
 0xecd   :  { %v1113_v17 = vpop.f32.mrb[34].mxu0 }
 0xece   :  { %2190 = vtanh.f32 %v1116_v15  ;;  %v2021_v18 = vpop.f32.mrb[35].mxu0  ;;  %v1791_v23 = vmul.f32 -1.442695, %v1116_v15 }
 0xecf   :  { %2192 = vpow2.f32 %v1789_v22 }
 0xed0   :  { %2194 = vpow2.f32 %v1791_v23 }
 0xed2   :  { %v2189_v19 = vpop.eup %2188 }
 0xed3   :  { %1059 = vrot.lane.b32.xlu1 %v2189_v19, %s2254_s19 }
 0xed8   :  { %v2191_v21 = vpop.eup %2190 }
 0xed9   :  { %1126 = vrot.lane.b32.xlu0 %v2191_v21, %s2254_s19  ;;  %v2193_v24 = vpop.eup %2192 }
 0xeda   :  { %v1053_v25 = vadd.f32 1.0, %v2193_v24  ;;  %v2195_v26 = vpop.eup %2194 }
 0xedb   :  { %v1120_v27 = vadd.f32 1.0, %v2195_v26 }
 0xedc   :  { %2196 = vrcp.f32 %v1053_v25 }
 0xedd   :  { %2198 = vrcp.f32 %v1120_v27 }
 0xee6   :  { %v2197_v28 = vpop.eup %2196 }
 0xee7   :  { %v2199_v31 = vpop.eup %2198  ;;  %v1057_v38 = vmul.f32 %v2197_v28, %v2537_v49 }
 0xee8   :  { %v1124_v41 = vmul.f32 %v2199_v31, %v2541_v52 }
 0xf45   :  { %v1060_v29 = vpop.permute.xlu1 %1059 }
 0xf46   :  { %v1062_v30 = vmul.f32 %v2197_v28, %v1060_v29 }
 0xf48   :  { %1064 = vrot.lane.b32.xlu1 %v1062_v30, %s2255_s3 }
 0xf4b   :  { %v1127_v36 = vpop.permute.xlu0 %1126 }
 0xf4c   :  { %v1129_v37 = vmul.f32 %v2199_v31, %v1127_v36 }
 0xf4e   :  { %1131 = vrot.lane.b32.xlu0 %v1129_v37, %s2255_s3 }
 0xfba   :  { %v1065_v39 = vpop.permute.xlu1 %1064 }
 0xfbb   :  { %v2579_v40 = vadd.f32 %v1065_v39, %v1057_v38  ;;  %v2244_v38 = vld [vmem:[%s2721_s4] sm:$0xff]  }
 0xfbd   :  { %2200 = vtanh.f32 %v2579_v40 }
 0xfc0   :  { %v1132_v42 = vpop.permute.xlu0 %1131 }
 0xfc1   :  { %v2583_v43 = vadd.f32 %v1132_v42, %v1124_v41  ;;  %v2246_v41 = vld [vmem:[%s2719_s2] sm:$0xff]   ;;  %v2247_v42 = vld [vmem:[%s2719_s2 + $0x8] sm:$0xff]  }
 0xfc3   :  { %2202 = vtanh.f32 %v2583_v43 }
 0xfc7   :  { %v2201_v44 = vpop.eup %2200 }
 0xfc8   :  { %1070 = vrot.lane.b32.xlu1 %v2201_v44, %s2254_s19  ;;  %v2249_v44 = vld [vmem:[%s2722_s5 + $0x8] sm:$0xff]  }
 0xfcd   :  { %v2203_v45 = vpop.eup %2202 }
 0xfce   :  { %1137 = vrot.lane.b32.xlu0 %v2203_v45, %s2254_s19 }
0x103a   :  { %v1071_v47 = vpop.permute.xlu1 %1070 }
0x103b   :  { %v2588_v48 = vmul.f32 %v2197_v28, %v1071_v47 }
0x103d   :  { %v1074_v49 = vpack.c.bf16 %v2588_v48, %v2588_v48 }
0x103f   :  { %1189 = vrot.lane.b32.xlu1 %v1074_v49, %s2255_s3 }
0x1040   :  { %v1138_v50 = vpop.permute.xlu0 %1137 }
0x1041   :  { %v1140_v51 = vmul.f32 %v2199_v31, %v1138_v50 }
0x1043   :  { %v1141_v52 = vpack.c.bf16 %v1140_v51, %v1140_v51 }
0x1045   :  { %1143 = vrot.lane.b32.xlu0 %v1141_v52, %s2255_s3 }
0x10b1   :  { %v1190_v53 = vpop.permute.xlu1 %1189 }
0x10b2   :  { %2035 = vmatmul.mubr.msk.bf16.vlgmr.msra.gmra.mrb[36].mxu0 %vm129_vm3, %v1190_v53 }
0x10b3   :  { %2047 = vmatpush3.bf16.msra.mxu0 %v2352_v32  ;;  %2050 = vmatprep.mubr.msk.bf16.mxu0 %vm2252_vm1, %v2251_v0 }
0x10b4   :  { %2048 = vmatprep.subr.bf16.mxu0 %v2251_v0 }
0x10b7   :  { %v1144_v54 = vpop.permute.xlu0 %1143  ;;  %2049 = vmatpush3.bf16.msra.mxu0 %v2363_v34 }
0x10b8   :  { %2027 = vmatmul.mubr.msk.bf16.vlgmr.msra.gmra.mrb[32].mxu1 %vm129_vm3, %v1144_v54  ;;  %2062 = vmatprep.subr.bf16.mxu0 %v2251_v0 }
0x10b9   :  { %2039 = vmatpush3.bf16.msra.mxu1 %v2323_v6  ;;  %2042 = vmatprep.mubr.msk.bf16.mxu1 %vm2252_vm1, %v2251_v0 }
0x10ba   :  { %2040 = vmatprep.subr.bf16.mxu1 %v2251_v0 }
0x10bd   :  { %2041 = vmatpush3.bf16.msra.mxu1 %v2331_v7 }
0x10be   :  { %2054 = vmatprep.subr.bf16.mxu1 %v2251_v0 }
0x10c0   :  { %2043 = vmatmul.mubr.msk.bf16.vlgmr.msra.gmra.mrb[36].mxu1 %vm129_vm3, %v1144_v54 }
0x10c1   :  { %2055 = vmatpush3.bf16.msra.mxu1 %v2357_v33  ;;  %2058 = vmatprep.mubr.msk.bf16.mxu1 %vm2252_vm1, %v2251_v0 }
0x10c2   :  { %2056 = vmatprep.subr.bf16.mxu1 %v2251_v0 }
0x10c5   :  { %2057 = vmatpush3.bf16.msra.mxu1 %v2370_v35 }
0x10c6   :  { %2070 = vmatprep.subr.bf16.mxu1 %v2251_v0 }
0x1185   :  { %v1228_v6 = vpop.f32.mrb[36].mxu0 }
0x1186   :  { %v2036_v32 = vpop.f32.mrb[37].mxu0 }
0x1187   :  { %v1231_v34 = vpop.f32.mrb[38].mxu0 }
0x1188   :  { %v2037_v56 = vpop.f32.mrb[39].mxu0  ;;  %v1445_v34 = vld [vmem:[#allocation2 + $0xe] sm:$0x3] }
0x118b   :  { %v1182_v7 = vpop.f32.mrb[32].mxu1 }
0x118c   :  { %v1229_v55 = vadd.f32 %v1228_v6, %v1182_v7  ;;  %v2028_v57 = vpop.f32.mrb[33].mxu1 }
0x118d   :  { %v1185_v59 = vpop.f32.mrb[34].mxu1 }
0x118e   :  { %v1234_v60 = vadd.f32 %v2402_v46, %v1229_v55  ;;  %v2029_v33 = vpop.f32.mrb[35].mxu1 }
0x1190   :  { %2204 = vtanh.f32 %v1234_v60  ;;  %v1794_v5 = vmul.f32 -1.442695, %v1234_v60 }
0x1193   :  { %v1295_v62 = vpop.f32.mrb[36].mxu1 }
0x1194   :  { %v1301_v63 = vadd.f32 %v1295_v62, %v1260_v61  ;;  %v2044_v1 = vpop.f32.mrb[37].mxu1 }
0x1195   :  { %v1298_v2 = vpop.f32.mrb[38].mxu1 }
0x1196   :  { %2206 = vtanh.f32 %v1301_v63  ;;  %v2045_v35 = vpop.f32.mrb[39].mxu1  ;;  %v1796_v8 = vmul.f32 -1.442695, %v1301_v63 }
0x1197   :  { %2208 = vpow2.f32 %v1794_v5 }
0x1198   :  { %2210 = vpow2.f32 %v1796_v8 }
0x119a   :  { %v2205_v3 = vpop.eup %2204 }
0x119b   :  { %1244 = vrot.lane.b32.xlu1 %v2205_v3, %s2254_s19 }
0x11a0   :  { %v2207_v4 = vpop.eup %2206 }
0x11a1   :  { %1311 = vrot.lane.b32.xlu0 %v2207_v4, %s2254_s19  ;;  %v2209_v9 = vpop.eup %2208 }
0x11a2   :  { %v1238_v11 = vadd.f32 1.0, %v2209_v9  ;;  %v2211_v20 = vpop.eup %2210 }
0x11a3   :  { %v1305_v10 = vadd.f32 1.0, %v2211_v20 }
0x11a4   :  { %2212 = vrcp.f32 %v1238_v11 }
0x11a5   :  { %2214 = vrcp.f32 %v1305_v10 }
0x11ae   :  { %v2213_v12 = vpop.eup %2212 }
0x11af   :  { %v2215_v15 = vpop.eup %2214  ;;  %v1242_v18 = vmul.f32 %v2213_v12, %v2579_v40  ;;  %v2245_v40 = vld [vmem:[%s2721_s4 + $0x8] sm:$0xff]  }
0x11b0   :  { %v1309_v22 = vmul.f32 %v2215_v15, %v2583_v43  ;;  %v2248_v43 = vld [vmem:[%s2722_s5] sm:$0xff]  }
0x120d   :  { %v1245_v13 = vpop.permute.xlu1 %1244 }
0x120e   :  { %v1247_v14 = vmul.f32 %v2213_v12, %v1245_v13 }
0x1210   :  { %1249 = vrot.lane.b32.xlu1 %v1247_v14, %s2255_s3 }
0x1213   :  { %v1312_v16 = vpop.permute.xlu0 %1311 }
0x1214   :  { %v1314_v17 = vmul.f32 %v2215_v15, %v1312_v16 }
0x1216   :  { %1316 = vrot.lane.b32.xlu0 %v1314_v17, %s2255_s3 }
0x1282   :  { %v1250_v19 = vpop.permute.xlu1 %1249 }
0x1283   :  { %v2621_v21 = vadd.f32 %v1250_v19, %v1242_v18 }
0x1285   :  { %2216 = vtanh.f32 %v2621_v21 }
0x1288   :  { %v1317_v23 = vpop.permute.xlu0 %1316 }
0x1289   :  { %v2625_v24 = vadd.f32 %v1317_v23, %v1309_v22 }
0x128b   :  { %2218 = vtanh.f32 %v2625_v24 }
0x128f   :  { %v2217_v25 = vpop.eup %2216 }
0x1290   :  { %1255 = vrot.lane.b32.xlu1 %v2217_v25, %s2254_s19 }
0x1295   :  { %v2219_v26 = vpop.eup %2218 }
0x1296   :  { %1322 = vrot.lane.b32.xlu0 %v2219_v26, %s2254_s19 }
0x1302   :  { %v1256_v27 = vpop.permute.xlu1 %1255 }
0x1303   :  { %v2630_v28 = vmul.f32 %v2213_v12, %v1256_v27 }
0x1305   :  { %v1259_v29 = vpack.c.bf16 %v2630_v28, %v2630_v28  ;;  %v1639_v16 = vrot.slane %v2630_v28, 6 }
0x1307   :  { %1374 = vrot.lane.b32.xlu1 %v1259_v29, %s2255_s3  ;;  %v1652_v22 = vsel %vm50_vm0, %v2588_v48, %v1639_v16 }
0x1308   :  { %v1323_v30 = vpop.permute.xlu0 %1322 }
0x1309   :  { %v1325_v31 = vmul.f32 %v2215_v15, %v1323_v30 }
0x130b   :  { %v1326_v36 = vpack.c.bf16 %v1325_v31, %v1325_v31 }
0x130d   :  { %1328 = vrot.lane.b32.xlu0 %v1326_v36, %s2255_s3 }
0x1379   :  { %v1375_v37 = vpop.permute.xlu1 %1374 }
0x137a   :  { %2059 = vmatmul.mubr.msk.bf16.vlgmr.msra.gmra.mrb[40].mxu1 %vm129_vm3, %v1375_v37 }
0x137b   :  { %2071 = vmatpush3.bf16.msra.mxu1 %v2244_v38  ;;  %2074 = vmatprep.mubr.msk.bf16.mxu1 %vm2252_vm1, %v2251_v0 }
0x137c   :  { %2072 = vmatprep.subr.bf16.mxu1 %v2251_v0 }
0x137f   :  { %v1329_v39 = vpop.permute.xlu0 %1328  ;;  %2073 = vmatpush3.bf16.msra.mxu1 %v2245_v40  ;;  %v2250_v40 = vld [vmem:[%s2723_s6] ss:$0 sm:$0xff] }
0x1380   :  { %2051 = vmatmul.mubr.msk.bf16.vlgmr.msra.gmra.mrb[40].mxu0 %vm129_vm3, %v1329_v39 }
0x1381   :  { %2063 = vmatpush3.bf16.msra.mxu0 %v2246_v41  ;;  %2066 = vmatprep.mubr.msk.bf16.mxu0 %vm2252_vm1, %v2251_v0 }
0x1382   :  { %2064 = vmatprep.subr.bf16.mxu0 %v2251_v0 }
0x1385   :  { %2065 = vmatpush3.bf16.msra.mxu0 %v2247_v42 }
0x1386   :  { %2078 = vmatprep.subr.bf16.mxu0 %v2251_v0 }
0x1388   :  { %2067 = vmatmul.mubr.msk.bf16.vlgmr.msra.gmra.mrb[44].mxu0 %vm129_vm3, %v1329_v39 }
0x1389   :  { %2079 = vmatpush3.bf16.msra.mxu0 %v2248_v43  ;;  %2082 = vmatprep.mubr.msk.bf16.mxu0 %vm2252_vm1, %v2251_v0 }
0x138a   :  { %2080 = vmatprep.subr.bf16.mxu0 %v2251_v0 }
0x138d   :  { %2081 = vmatpush3.bf16.msra.mxu0 %v2249_v44 }
0x144d   :  { %v1413_v45 = vpop.f32.mrb[40].mxu1 }
0x144e   :  { %v2060_v47 = vpop.f32.mrb[41].mxu1 }
0x144f   :  { %v1416_v49 = vpop.f32.mrb[42].mxu1 }
0x1450   :  { %v2061_v50 = vpop.f32.mrb[43].mxu1 }
0x1453   :  { %v1367_v51 = vpop.f32.mrb[40].mxu0 }
0x1454   :  { %v1414_v52 = vadd.f32 %v1413_v45, %v1367_v51  ;;  %v2052_v53 = vpop.f32.mrb[41].mxu0 }
0x1455   :  { %v1370_v54 = vpop.f32.mrb[42].mxu0 }
0x1456   :  { %v1419_v6 = vadd.f32 %v2402_v46, %v1414_v52  ;;  %v2053_v32 = vpop.f32.mrb[43].mxu0 }
0x1457   :  { %v1655_v32 = vld [vmem:[%s2724_s7] sm:$0xff] }
0x1458   :  { %2220 = vtanh.f32 %v1419_v6  ;;  %v1799_v33 = vmul.f32 -1.442695, %v1419_v6 }
0x145b   :  { %v1480_v56 = vpop.f32.mrb[44].mxu0 }
0x145c   :  { %v1486_v0 = vadd.f32 %v1480_v56, %v1445_v34  ;;  %v2068_v7 = vpop.f32.mrb[45].mxu0  ;;  %v1656_v34 = vld [vmem:[%s2724_s7 + $0x8] sm:$0xff]  ;;  %v1657_v56 = vld [vmem:[%s2724_s7 + $0x10] sm:$0xff] }
0x145d   :  { %v1483_v55 = vpop.f32.mrb[46].mxu0 }
0x145e   :  { %2222 = vtanh.f32 %v1486_v0  ;;  %v2069_v57 = vpop.f32.mrb[47].mxu0  ;;  %v1801_v61 = vmul.f32 -1.442695, %v1486_v0  ;;  %v1658_v0 = vld [vmem:[%s2724_s7 + $0x18] sm:$0xff] }
0x145f   :  { %2224 = vpow2.f32 %v1799_v33  ;;  %v2101_v7 = vpack.c.bf16 %v1658_v0, %v1657_v56  ;;  %v14_v57 = vstv %s2725_s8 }
0x1460   :  { %2226 = vpow2.f32 %v1801_v61  ;;  %15 = vst [vmem:[#allocation3] sm:$0x1] %v14_v57 }
0x1462   :  { %v2221_v59 = vpop.eup %2220 }
0x1463   :  { %1429 = vrot.lane.b32.xlu0 %v2221_v59, %s2254_s19 }
0x1468   :  { %v2223_v60 = vpop.eup %2222 }
0x1469   :  { %1496 = vrot.lane.b32.xlu1 %v2223_v60, %s2254_s19  ;;  %v2225_v46 = vpop.eup %2224 }
0x146a   :  { %v1423_v62 = vadd.f32 1.0, %v2225_v46  ;;  %v2227_v63 = vpop.eup %2226 }
0x146b   :  { %v1490_v1 = vadd.f32 1.0, %v2227_v63 }
0x146c   :  { %2228 = vrcp.f32 %v1423_v62  ;;  %v1805_v62 = vld [vmem:[#allocation3] ss:$0 sm:$0xff] }
0x146d   :  { %2230 = vrcp.f32 %v1490_v1 }
0x1476   :  { %v2229_v2 = vpop.eup %2228 }
0x1477   :  { %v2231_v4 = vpop.eup %2230  ;;  %v1427_v9 = vmul.f32 %v2229_v2, %v2621_v21 }
0x1478   :  { %v1494_v10 = vmul.f32 %v2231_v4, %v2625_v24 }
0x14d5   :  { %v1430_v35 = vpop.permute.xlu0 %1429 }
0x14d6   :  { %v1432_v3 = vmul.f32 %v2229_v2, %v1430_v35 }
0x14d8   :  { %1434 = vrot.lane.b32.xlu0 %v1432_v3, %s2255_s3 }
0x14db   :  { %v1497_v5 = vpop.permute.xlu1 %1496 }
0x14dc   :  { %v1499_v8 = vmul.f32 %v2231_v4, %v1497_v5 }
0x14de   :  { %1501 = vrot.lane.b32.xlu1 %v1499_v8, %s2255_s3 }
0x154a   :  { %v1435_v11 = vpop.permute.xlu0 %1434 }
0x154b   :  { %v1437_v20 = vadd.f32 %v1435_v11, %v1427_v9 }
0x154d   :  { %2232 = vtanh.f32 %v1437_v20 }
0x1550   :  { %v1502_v12 = vpop.permute.xlu1 %1501 }
0x1551   :  { %v1504_v13 = vadd.f32 %v1502_v12, %v1494_v10 }
0x1553   :  { %2234 = vtanh.f32 %v1504_v13 }
0x1557   :  { %v2233_v14 = vpop.eup %2232 }
0x1558   :  { %1440 = vrot.lane.b32.xlu0 %v2233_v14, %s2254_s19 }
0x155d   :  { %v2235_v15 = vpop.eup %2234 }
0x155e   :  { %1507 = vrot.lane.b32.xlu1 %v2235_v15, %s2254_s19 }
0x15ca   :  { %v1441_v17 = vpop.permute.xlu0 %1440 }
0x15cb   :  { %v1443_v18 = vmul.f32 %v2229_v2, %v1441_v17 }
0x15cd   :  { %v1444_v19 = vpack.c.bf16 %v1443_v18, %v1443_v18  ;;  %v1642_v21 = vrot.slane %v1443_v18, 4 }
0x15cf   :  { %1559 = vrot.lane.b32.xlu1 %v1444_v19, %s2255_s3  ;;  %v1653_v23 = vsel %vm1648_vm4, %v1652_v22, %v1642_v21 }
0x15d0   :  { %v1508_v24 = vpop.permute.xlu1 %1507 }
0x15d1   :  { %v1510_v25 = vmul.f32 %v2231_v4, %v1508_v24 }
0x15d3   :  { %v1511_v26 = vpack.c.bf16 %v1510_v25, %v1510_v25 }
0x15d5   :  { %1513 = vrot.lane.b32.xlu0 %v1511_v26, %s2255_s3 }
0x1641   :  { %v1560_v27 = vpop.permute.xlu1 %1559 }
0x1642   :  { %2083 = vmatmul.mubr.msk.bf16.vlgmr.msra.gmra.mrb[48].mxu0 %vm129_vm3, %v1560_v27 }
0x1647   :  { %v1514_v28 = vpop.permute.xlu0 %1513 }
0x1648   :  { %2075 = vmatmul.mubr.msk.bf16.vlgmr.msra.gmra.mrb[44].mxu1 %vm129_vm3, %v1514_v28 }
0x1715   :  { %v1598_v29 = vpop.f32.mrb[48].mxu0 }
0x1716   :  { %v2084_v30 = vpop.f32.mrb[49].mxu0 }
0x1717   :  { %v1601_v31 = vpop.f32.mrb[50].mxu0 }
0x1718   :  { %v2085_v36 = vpop.f32.mrb[51].mxu0 }
0x171b   :  { %v1552_v48 = vpop.f32.mrb[44].mxu1 }
0x171c   :  { %v1599_v37 = vadd.f32 %v1598_v29, %v1552_v48  ;;  %v2076_v38 = vpop.f32.mrb[45].mxu1 }
0x171d   :  { %v1555_v39 = vpop.f32.mrb[46].mxu1 }
0x171e   :  { %v1604_v41 = vadd.f32 %v2250_v40, %v1599_v37  ;;  %v2077_v42 = vpop.f32.mrb[47].mxu1 }
0x1720   :  { %2236 = vtanh.f32 %v1604_v41  ;;  %v1804_v44 = vmul.f32 -1.442695, %v1604_v41 }
0x1722   :  { %2238 = vpow2.f32 %v1804_v44 }
0x172a   :  { %v2237_v43 = vpop.eup %2236 }
0x172b   :  { %1614 = vrot.lane.b32.xlu0 %v2237_v43, %s2254_s19 }
0x172c   :  { %v2239_v45 = vpop.eup %2238 }
0x172d   :  { %v1608_v47 = vadd.f32 1.0, %v2239_v45 }
0x172f   :  { %2240 = vrcp.f32 %v1608_v47 }
0x1739   :  { %v2241_v49 = vpop.eup %2240 }
0x173a   :  { %v1612_v52 = vmul.f32 %v2241_v49, %v1437_v20 }
0x179d   :  { %v1615_v50 = vpop.permute.xlu0 %1614 }
0x179e   :  { %v1617_v51 = vmul.f32 %v2241_v49, %v1615_v50 }
0x17a0   :  { %1619 = vrot.lane.b32.xlu1 %v1617_v51, %s2255_s3 }
0x17a4   :  { %1668 = vrot.lane.b32.xlu1 %v2549_v58, %s2255_s3  ;;  %v2097_v58 = vpack.c.bf16 %v1656_v34, %v1655_v32 }
0x17a6   :  { %2098 = vmatprep.subr.bf16.mxu1 %v2097_v58 }
0x17a7   :  { %2100 = vmatpush3.bf16.msra.mxu1 %v2097_v58 }
0x17a8   :  { %2102 = vmatprep.subr.bf16.mxu1 %v2101_v7 }
0x17ab   :  { %2104 = vmatpush3.bf16.msra.mxu1 %v2101_v7 }
0x1812   :  { %v1620_v53 = vpop.permute.xlu1 %1619 }
0x1813   :  { %v1622_v54 = vadd.f32 %v1620_v53, %v1612_v52 }
0x1815   :  { %2242 = vtanh.f32 %v1622_v54 }
0x1816   :  { %v1669_v6 = vpop.permute.xlu1 %1668 }
0x1817   :  { %2094 = vmatprep.mubr.msk.f32.mxu1 %vm129_vm3, %v1669_v6 }
0x181f   :  { %v2243_v55 = vpop.eup %2242 }
0x1820   :  { %1625 = vrot.lane.b32.xlu0 %v2243_v55, %s2254_s19 }
0x1892   :  { %v1626_v59 = vpop.permute.xlu0 %1625 }
0x1893   :  { %v1628_v60 = vmul.f32 %v2241_v49, %v1626_v59 }
0x1895   :  { %v1645_v33 = vrot.slane %v1628_v60, 2 }
0x1897   :  { %v1654_v61 = vsel %vm1650_vm5, %v1653_v23, %v1645_v33 }
0x1898   :  { %1670 = vrot.lane.b32.xlu0 %v1654_v61, %s2255_s3 }
0x190a   :  { %v1671_v46 = vpop.permute.xlu0 %1670 }
0x190b   :  { %2095 = vmatmul.mubr.msk.f32.vlgmr.msra.gmra.mrb[48].mxu1 %vm129_vm3, %v1671_v46 }
0x19de   :  { %v2096_v63 = vpop.f32.mrb[48].mxu1 }
0x19df   :  { %v1748_v1 = vadd.f32 %v2096_v63, %v1805_v62  ;;  %v1742_v2 = vpop.f32.mrb[49].mxu1 }
0x19e0   :  { %v1743_v35 = vadd.f32 %v1805_v62, %v1742_v2 }
0x19e1   :  { %1753 = vst.msk [vmem:[%s2726_s9 + $0x8] sm:$0xff] %vm1751_vm6, %v1748_v1 }
0x19e2   :  { %1752 = vst.msk [vmem:[%s2726_s9] sm:$0xff] %vm1751_vm6, %v1743_v35 }

</bundles_post_ra>
